<compile_context>
chip_gen: v7x
topology: tpu7x:2x2x1
jax: 0.10.0
libtpu: 0.0.40
codegen_flags: <defaults>
</compile_context>

<pallas_src>
import jax
import jax.numpy as jnp
from jax.experimental import pallas as pl
from jax.experimental.pallas import tpu as pltpu

# ---- problem sizes (small, consistent with the module's forward) -----------
B = 2          # batch
F = 16         # feature_shape_size (input to `convert`)
L = 8          # max_len (seq length after `convert`)
H = 32         # hid_dim
NH, HD = 4, 8  # heads, head_dim (NH * HD == H)
PF = 64        # positionwise feed-forward dim
OUT = 10       # output_dim of fc_out
VOCAB = 256    # token ids are in [0, 255] after the *255 + int cast
PAD_IDX = 1    # src_pad_idx
LN_EPS = 1e-5  # PyTorch nn.LayerNorm default

# rows of the packed bias/gain array (row width = widest needed = 3*H)
VEC_W = 3 * H
(R_BC, R_BQKV, R_BO, R_G1, R_BE1,
 R_B1, R_B2, R_G2, R_BE2, R_BOUT) = range(10)
NVEC = 10


def _vmem():
    return pl.BlockSpec(memory_space=pltpu.MemorySpace.VMEM)


# ---------------------------------------------------------------------------
# Fused kernel: convert + normalize + tokenize + encoder (embed, masked MHA,
# FFN, LayerNorms) + fc_out.  Everything lives in VMEM / vregs.
# ---------------------------------------------------------------------------
def fused_kernel(src_ref, wc_ref, emb_ref, pos_ref, wqkv_ref, wo_ref,
                 w1_ref, w2_ref, wout_ref, vec_ref, out_ref):
    # unpack the packed bias/gain rows with static slices
    vec = vec_ref[...]
    bc   = vec[R_BC:R_BC + 1, :L]
    bqkv = vec[R_BQKV:R_BQKV + 1, :3 * H]
    bo   = vec[R_BO:R_BO + 1, :H]
    g1   = vec[R_G1:R_G1 + 1, :H]
    be1  = vec[R_BE1:R_BE1 + 1, :H]
    b1   = vec[R_B1:R_B1 + 1, :PF]
    b2   = vec[R_B2:R_B2 + 1, :H]
    g2   = vec[R_G2:R_G2 + 1, :H]
    be2  = vec[R_BE2:R_BE2 + 1, :H]
    bout = vec[R_BOUT:R_BOUT + 1, :OUT]

    # ---- stage 1: convert + per-row min/max normalize + integer tokenize ----
    y = jnp.dot(src_ref[...], wc_ref[...],
                preferred_element_type=jnp.float32) + bc               # [B, L]
    y = y - jnp.min(y, axis=1, keepdims=True)
    # guard constant rows (max == 0) -> tokens become 0 instead of NaN garbage
    mx = jnp.maximum(jnp.max(y, axis=1, keepdims=True), 1e-12)
    y = y / mx                       # exact divide: row max maps exactly to 255
    tokens = (y * 255.0).astype(jnp.int32)   # trunc toward zero == torch .long() here
    key_mask = tokens != PAD_IDX                                       # [B, L]

    # ---- token embedding via one-hot matmul on the MXU ----
    iota_v = jax.lax.broadcasted_iota(jnp.int32, (B, L, VOCAB), 2)
    onehot = (tokens[:, :, None] == iota_v).astype(jnp.float32)
    onehot = onehot.reshape(B * L, VOCAB)        # leading-dim merge, lane dim kept
    x2 = jnp.dot(onehot, emb_ref[...], preferred_element_type=jnp.float32)
    x2 = x2 * jnp.sqrt(jnp.float32(H)) + pos_ref[...]   # pos pre-tiled to (B*L, H)

    def layernorm(v, g, b):
        mu = jnp.mean(v, axis=-1, keepdims=True)
        var = jnp.mean((v - mu) ** 2, axis=-1, keepdims=True)
        return (v - mu) * jax.lax.rsqrt(var + LN_EPS) * g + b

    # ---- fused Q/K/V projection: one lane-dense [B*L, 3H] matmul ----
    qkv = jnp.dot(x2, wqkv_ref[...], preferred_element_type=jnp.float32) + bqkv
    q3 = qkv[:, 0:H].reshape(B, L, H)
    k3 = qkv[:, H:2 * H].reshape(B, L, H)
    v3 = qkv[:, 2 * H:3 * H].reshape(B, L, H)

    wo = wo_ref[...]
    inv_sqrt_hd = 1.0 / jnp.sqrt(jnp.float32(HD))
    # accumulate per-head context straight through the matching W_o row block
    # (removes the cross-lane concat of the previous version)
    attn_out = bo                                                      # (1, H)
    for h in range(NH):                                                # static unroll
        sl = slice(h * HD, (h + 1) * HD)
        qs, ks, vs = q3[:, :, sl], k3[:, :, sl], v3[:, :, sl]
        energy = jnp.einsum('bld,bmd->blm', qs, ks,
                            preferred_element_type=jnp.float32) * inv_sqrt_hd
        energy = jnp.where(key_mask[:, None, :], energy, -1e10)        # masked_fill
        m = jnp.max(energy, axis=-1, keepdims=True)
        p = jnp.exp(energy - m)
        attn = p * pl.reciprocal(jnp.sum(p, axis=-1, keepdims=True), approx=True)
        ctx = jnp.einsum('blm,bmd->bld', attn, vs,
                         preferred_element_type=jnp.float32)           # (B, L, HD)
        attn_out = attn_out + jnp.dot(ctx.reshape(B * L, HD), wo[sl, :],
                                      preferred_element_type=jnp.float32)

    # residual + layernorm 1  (dropout is identity in eval mode)
    x2 = layernorm(x2 + attn_out, g1, be1)

    # positionwise feed-forward + residual + layernorm 2
    ff = jnp.maximum(jnp.dot(x2, w1_ref[...],
                             preferred_element_type=jnp.float32) + b1, 0.0)
    ff = jnp.dot(ff, w2_ref[...], preferred_element_type=jnp.float32) + b2
    x2 = layernorm(x2 + ff, g2, be2)

    # output = self.fc_out(enc_src)   -> stored as a 2D [B*L, OUT] slab
    out_ref[...] = jnp.dot(x2, wout_ref[...],
                           preferred_element_type=jnp.float32) + bout


# ---------------------------------------------------------------------------
# Params / wrapper
# ---------------------------------------------------------------------------
def init_params(key):
    ks = jax.random.split(key, 12)

    def rnd(k, shape, scale=0.1):
        return jax.random.normal(k, shape, dtype=jnp.float32) * scale

    wq, wk, wv = rnd(ks[4], (H, H)), rnd(ks[5], (H, H)), rnd(ks[6], (H, H))

    vec = jnp.zeros((NVEC, VEC_W), jnp.float32)
    vec = vec.at[R_BC, :L].set(rnd(ks[1], (L,)))
    vec = vec.at[R_G1, :H].set(1.0)       # LayerNorm 1 gamma
    vec = vec.at[R_G2, :H].set(1.0)       # LayerNorm 2 gamma
    vec = vec.at[R_BOUT, :OUT].set(rnd(ks[11], (OUT,)))
    # bqkv / bo / be1 / b1 / b2 / be2 stay zero (matches previous init)

    pos = rnd(ks[3], (L, H))
    return dict(
        wc=rnd(ks[0], (F, L)),
        tok_emb=rnd(ks[2], (VOCAB, H)),
        pos_tiled=jnp.tile(pos, (B, 1)),                # (B*L, H), tiled once at init
        wqkv=jnp.concatenate([wq, wk, wv], axis=1),     # (H, 3H) fused QKV weight
        wo=rnd(ks[7], (H, H)),
        w1=rnd(ks[8], (H, PF)),
        w2=rnd(ks[9], (PF, H)),
        wout=rnd(ks[10], (H, OUT)),
        vec=vec,                                        # packed biases/gains
    )


@jax.jit
def seq2seq_without_decoder(src, params):
    args = (src, params['wc'], params['tok_emb'], params['pos_tiled'],
            params['wqkv'], params['wo'], params['w1'], params['w2'],
            params['wout'], params['vec'])
    out2d = pl.pallas_call(
        fused_kernel,
        out_shape=jax.ShapeDtypeStruct((B * L, OUT), jnp.float32),
        in_specs=[_vmem()] * len(args),
        out_specs=_vmem(),
    )(*args)
    # lane-dense 2D slab out of the kernel; cheap reshape in the wrapper
    return out2d.reshape(B, L, OUT)


if __name__ == "__main__":
    key = jax.random.PRNGKey(0)
    k_src, k_par = jax.random.split(key)
    src = jax.random.normal(k_src, (B, F), dtype=jnp.float32)
    params = init_params(k_par)

    out = jax.block_until_ready(seq2seq_without_decoder(src, params))
    assert out.shape == (B, L, OUT) and out.dtype == jnp.float32
    assert bool(jnp.all(jnp.isfinite(out)))
    print("KERNEL_OK")
</pallas_src>

<mosaic_0001>
module attributes {stable_mosaic.version = 11 : i64} {
  func.func @fused_kernel(%arg0: memref<2x16xf32, #tpu.memory_space<vmem>>, %arg1: memref<16x8xf32, #tpu.memory_space<vmem>>, %arg2: memref<256x32xf32, #tpu.memory_space<vmem>>, %arg3: memref<16x32xf32, #tpu.memory_space<vmem>>, %arg4: memref<32x96xf32, #tpu.memory_space<vmem>>, %arg5: memref<32x32xf32, #tpu.memory_space<vmem>>, %arg6: memref<32x64xf32, #tpu.memory_space<vmem>>, %arg7: memref<64x32xf32, #tpu.memory_space<vmem>>, %arg8: memref<32x10xf32, #tpu.memory_space<vmem>>, %arg9: memref<10x96xf32, #tpu.memory_space<vmem>>, %arg10: memref<16x10xf32, #tpu.memory_space<vmem>>) attributes {dimension_semantics = [], scalar_prefetch = 0 : i64, scratch_operands = 0 : i64, tpu.core_type = #tpu.core_type<tc>} {
    %c0 = arith.constant 0 : index
    %c0_0 = arith.constant 0 : index
    %0 = vector.load %arg9[%c0, %c0_0] : memref<10x96xf32, #tpu.memory_space<vmem>>, vector<10x96xf32>
    %1 = vector.extract_strided_slice %0 {offsets = [0, 0], sizes = [1, 8], strides = [1, 1]} : vector<10x96xf32> to vector<1x8xf32>
    %2 = vector.extract_strided_slice %0 {offsets = [1, 0], sizes = [1, 96], strides = [1, 1]} : vector<10x96xf32> to vector<1x96xf32>
    %3 = vector.extract_strided_slice %0 {offsets = [2, 0], sizes = [1, 32], strides = [1, 1]} : vector<10x96xf32> to vector<1x32xf32>
    %4 = vector.extract_strided_slice %0 {offsets = [3, 0], sizes = [1, 32], strides = [1, 1]} : vector<10x96xf32> to vector<1x32xf32>
    %5 = vector.extract_strided_slice %0 {offsets = [4, 0], sizes = [1, 32], strides = [1, 1]} : vector<10x96xf32> to vector<1x32xf32>
    %6 = vector.extract_strided_slice %0 {offsets = [5, 0], sizes = [1, 64], strides = [1, 1]} : vector<10x96xf32> to vector<1x64xf32>
    %7 = vector.extract_strided_slice %0 {offsets = [6, 0], sizes = [1, 32], strides = [1, 1]} : vector<10x96xf32> to vector<1x32xf32>
    %8 = vector.extract_strided_slice %0 {offsets = [7, 0], sizes = [1, 32], strides = [1, 1]} : vector<10x96xf32> to vector<1x32xf32>
    %9 = vector.extract_strided_slice %0 {offsets = [8, 0], sizes = [1, 32], strides = [1, 1]} : vector<10x96xf32> to vector<1x32xf32>
    %10 = vector.extract_strided_slice %0 {offsets = [9, 0], sizes = [1, 10], strides = [1, 1]} : vector<10x96xf32> to vector<1x10xf32>
    %c0_1 = arith.constant 0 : index
    %c0_2 = arith.constant 0 : index
    %11 = vector.load %arg0[%c0_1, %c0_2] : memref<2x16xf32, #tpu.memory_space<vmem>>, vector<2x16xf32>
    %c0_3 = arith.constant 0 : index
    %c0_4 = arith.constant 0 : index
    %12 = vector.load %arg1[%c0_3, %c0_4] : memref<16x8xf32, #tpu.memory_space<vmem>>, vector<16x8xf32>
    %cst = arith.constant dense<0.000000e+00> : vector<2x8xf32>
    %13 = tpu.matmul %11, %12, %cst {dimension_numbers = #tpu.dot_dimension_numbers<[1], [0], [0], [1], [0, 0, 1, 1], [], []>} : vector<2x16xf32>, vector<16x8xf32>, vector<2x8xf32> -> vector<2x8xf32>
    %14 = vector.broadcast %1 : vector<1x8xf32> to vector<2x8xf32>
    %15 = arith.addf %13, %14 : vector<2x8xf32>
    %cst_5 = arith.constant dense<0x7F800000> : vector<2xf32>
    %16 = vector.multi_reduction <minimumf>, %15, %cst_5 [1] : vector<2x8xf32> to vector<2xf32>
    %17 = vector.shape_cast %16 : vector<2xf32> to vector<2x1xf32>
    %18 = vector.broadcast %17 : vector<2x1xf32> to vector<2x8xf32>
    %19 = arith.subf %15, %18 : vector<2x8xf32>
    %cst_6 = arith.constant dense<0xFF800000> : vector<2xf32>
    %20 = vector.multi_reduction <maximumf>, %19, %cst_6 [1] : vector<2x8xf32> to vector<2xf32>
    %21 = vector.shape_cast %20 : vector<2xf32> to vector<2x1xf32>
    %cst_7 = arith.constant 9.99999996E-13 : f32
    %22 = vector.broadcast %cst_7 : f32 to vector<2x1xf32>
    %23 = arith.maximumf %21, %22 : vector<2x1xf32>
    %24 = vector.broadcast %23 : vector<2x1xf32> to vector<2x8xf32>
    %25 = arith.divf %19, %24 : vector<2x8xf32>
    %cst_8 = arith.constant 2.550000e+02 : f32
    %26 = vector.broadcast %cst_8 : f32 to vector<2x8xf32>
    %27 = arith.mulf %25, %26 : vector<2x8xf32>
    %28 = arith.fptosi %27 : vector<2x8xf32> to vector<2x8xi32>
    %c1_i32 = arith.constant 1 : i32
    %29 = vector.broadcast %c1_i32 : i32 to vector<2x8xi32>
    %30 = arith.cmpi ne, %28, %29 : vector<2x8xi32>
    %31 = tpu.iota {dimensions = array<i32: 2>} : vector<2x8x256xi32>
    %32 = vector.shape_cast %28 : vector<2x8xi32> to vector<2x8x1xi32>
    %33 = vector.broadcast %32 : vector<2x8x1xi32> to vector<2x8x256xi32>
    %34 = arith.cmpi eq, %33, %31 : vector<2x8x256xi32>
    %35 = arith.extui %34 : vector<2x8x256xi1> to vector<2x8x256xi32>
    %36 = arith.sitofp %35 : vector<2x8x256xi32> to vector<2x8x256xf32>
    %37 = vector.shape_cast %36 : vector<2x8x256xf32> to vector<16x256xf32>
    %c0_9 = arith.constant 0 : index
    %c0_10 = arith.constant 0 : index
    %38 = vector.load %arg2[%c0_9, %c0_10] : memref<256x32xf32, #tpu.memory_space<vmem>>, vector<256x32xf32>
    %cst_11 = arith.constant dense<0.000000e+00> : vector<16x32xf32>
    %39 = tpu.matmul %37, %38, %cst_11 {dimension_numbers = #tpu.dot_dimension_numbers<[1], [0], [0], [1], [0, 0, 1, 1], [], []>} : vector<16x256xf32>, vector<256x32xf32>, vector<16x32xf32> -> vector<16x32xf32>
    %cst_12 = arith.constant 3.200000e+01 : f32
    %40 = math.sqrt %cst_12 : f32
    %41 = vector.broadcast %40 : f32 to vector<16x32xf32>
    %42 = arith.mulf %39, %41 : vector<16x32xf32>
    %c0_13 = arith.constant 0 : index
    %c0_14 = arith.constant 0 : index
    %43 = vector.load %arg3[%c0_13, %c0_14] : memref<16x32xf32, #tpu.memory_space<vmem>>, vector<16x32xf32>
    %44 = arith.addf %42, %43 : vector<16x32xf32>
    %c0_15 = arith.constant 0 : index
    %c0_16 = arith.constant 0 : index
    %45 = vector.load %arg4[%c0_15, %c0_16] : memref<32x96xf32, #tpu.memory_space<vmem>>, vector<32x96xf32>
    %cst_17 = arith.constant dense<0.000000e+00> : vector<16x96xf32>
    %46 = tpu.matmul %44, %45, %cst_17 {dimension_numbers = #tpu.dot_dimension_numbers<[1], [0], [0], [1], [0, 0, 1, 1], [], []>} : vector<16x32xf32>, vector<32x96xf32>, vector<16x96xf32> -> vector<16x96xf32>
    %47 = vector.broadcast %2 : vector<1x96xf32> to vector<16x96xf32>
    %48 = arith.addf %46, %47 : vector<16x96xf32>
    %49 = vector.extract_strided_slice %48 {offsets = [0, 0], sizes = [16, 32], strides = [1, 1]} : vector<16x96xf32> to vector<16x32xf32>
    %50 = vector.shape_cast %49 : vector<16x32xf32> to vector<2x8x32xf32>
    %51 = vector.extract_strided_slice %48 {offsets = [0, 32], sizes = [16, 32], strides = [1, 1]} : vector<16x96xf32> to vector<16x32xf32>
    %52 = vector.shape_cast %51 : vector<16x32xf32> to vector<2x8x32xf32>
    %53 = vector.extract_strided_slice %48 {offsets = [0, 64], sizes = [16, 32], strides = [1, 1]} : vector<16x96xf32> to vector<16x32xf32>
    %54 = vector.shape_cast %53 : vector<16x32xf32> to vector<2x8x32xf32>
    %c0_18 = arith.constant 0 : index
    %c0_19 = arith.constant 0 : index
    %55 = vector.load %arg5[%c0_18, %c0_19] : memref<32x32xf32, #tpu.memory_space<vmem>>, vector<32x32xf32>
    %cst_20 = arith.constant 8.000000e+00 : f32
    %56 = math.sqrt %cst_20 : f32
    %cst_21 = arith.constant 1.000000e+00 : f32
    %57 = arith.divf %cst_21, %56 : f32
    %58 = vector.extract_strided_slice %50 {offsets = [0, 0, 0], sizes = [2, 8, 8], strides = [1, 1, 1]} : vector<2x8x32xf32> to vector<2x8x8xf32>
    %59 = vector.extract_strided_slice %52 {offsets = [0, 0, 0], sizes = [2, 8, 8], strides = [1, 1, 1]} : vector<2x8x32xf32> to vector<2x8x8xf32>
    %60 = vector.extract_strided_slice %54 {offsets = [0, 0, 0], sizes = [2, 8, 8], strides = [1, 1, 1]} : vector<2x8x32xf32> to vector<2x8x8xf32>
    "tpu.trace_start"() <{level = 10 : i32, message = "bld,bmd->blm"}> : () -> ()
    %cst_22 = arith.constant dense<0.000000e+00> : vector<2x8x8xf32>
    %61 = tpu.matmul %58, %59, %cst_22 {dimension_numbers = #tpu.dot_dimension_numbers<[2], [2], [1], [1], [0, 0, 0, 1, 1, 1], [0], [0]>} : vector<2x8x8xf32>, vector<2x8x8xf32>, vector<2x8x8xf32> -> vector<2x8x8xf32>
    "tpu.trace_stop"() : () -> ()
    %62 = vector.broadcast %57 : f32 to vector<2x8x8xf32>
    %63 = arith.mulf %61, %62 : vector<2x8x8xf32>
    %64 = vector.shape_cast %30 : vector<2x8xi1> to vector<2x1x8xi1>
    %cst_23 = arith.constant -1.000000e+10 : f32
    %65 = vector.shape_cast %64 : vector<2x1x8xi1> to vector<2x1x8xi1>
    %66 = vector.broadcast %65 : vector<2x1x8xi1> to vector<2x8x8xi1>
    %67 = vector.broadcast %cst_23 : f32 to vector<2x8x8xf32>
    %68 = arith.select %66, %63, %67 : vector<2x8x8xi1>, vector<2x8x8xf32>
    %cst_24 = arith.constant dense<0xFF800000> : vector<2x8xf32>
    %69 = vector.multi_reduction <maximumf>, %68, %cst_24 [2] : vector<2x8x8xf32> to vector<2x8xf32>
    %70 = vector.shape_cast %69 : vector<2x8xf32> to vector<2x8x1xf32>
    %71 = vector.broadcast %70 : vector<2x8x1xf32> to vector<2x8x8xf32>
    %72 = arith.subf %68, %71 : vector<2x8x8xf32>
    %73 = math.exp %72 : vector<2x8x8xf32>
    %cst_25 = arith.constant dense<0.000000e+00> : vector<2x8xf32>
    %74 = vector.multi_reduction <add>, %73, %cst_25 [2] : vector<2x8x8xf32> to vector<2x8xf32>
    %75 = vector.shape_cast %74 : vector<2x8xf32> to vector<2x8x1xf32>
    %76 = tpu.reciprocal %75 {approx = true} : vector<2x8x1xf32> -> vector<2x8x1xf32>
    %77 = vector.broadcast %76 : vector<2x8x1xf32> to vector<2x8x8xf32>
    %78 = arith.mulf %73, %77 : vector<2x8x8xf32>
    "tpu.trace_start"() <{level = 10 : i32, message = "blm,bmd->bld"}> : () -> ()
    %cst_26 = arith.constant dense<0.000000e+00> : vector<2x8x8xf32>
    %79 = tpu.matmul %78, %60, %cst_26 {dimension_numbers = #tpu.dot_dimension_numbers<[2], [1], [1], [2], [0, 0, 0, 1, 1, 2], [0], [0]>} : vector<2x8x8xf32>, vector<2x8x8xf32>, vector<2x8x8xf32> -> vector<2x8x8xf32>
    "tpu.trace_stop"() : () -> ()
    %80 = vector.shape_cast %79 : vector<2x8x8xf32> to vector<16x8xf32>
    %81 = vector.extract_strided_slice %55 {offsets = [0, 0], sizes = [8, 32], strides = [1, 1]} : vector<32x32xf32> to vector<8x32xf32>
    %cst_27 = arith.constant dense<0.000000e+00> : vector<16x32xf32>
    %82 = tpu.matmul %80, %81, %cst_27 {dimension_numbers = #tpu.dot_dimension_numbers<[1], [0], [0], [1], [0, 0, 1, 1], [], []>} : vector<16x8xf32>, vector<8x32xf32>, vector<16x32xf32> -> vector<16x32xf32>
    %83 = vector.broadcast %3 : vector<1x32xf32> to vector<16x32xf32>
    %84 = arith.addf %83, %82 : vector<16x32xf32>
    %85 = vector.extract_strided_slice %50 {offsets = [0, 0, 8], sizes = [2, 8, 8], strides = [1, 1, 1]} : vector<2x8x32xf32> to vector<2x8x8xf32>
    %86 = vector.extract_strided_slice %52 {offsets = [0, 0, 8], sizes = [2, 8, 8], strides = [1, 1, 1]} : vector<2x8x32xf32> to vector<2x8x8xf32>
    %87 = vector.extract_strided_slice %54 {offsets = [0, 0, 8], sizes = [2, 8, 8], strides = [1, 1, 1]} : vector<2x8x32xf32> to vector<2x8x8xf32>
    "tpu.trace_start"() <{level = 10 : i32, message = "bld,bmd->blm"}> : () -> ()
    %cst_28 = arith.constant dense<0.000000e+00> : vector<2x8x8xf32>
    %88 = tpu.matmul %85, %86, %cst_28 {dimension_numbers = #tpu.dot_dimension_numbers<[2], [2], [1], [1], [0, 0, 0, 1, 1, 1], [0], [0]>} : vector<2x8x8xf32>, vector<2x8x8xf32>, vector<2x8x8xf32> -> vector<2x8x8xf32>
    "tpu.trace_stop"() : () -> ()
    %89 = vector.broadcast %57 : f32 to vector<2x8x8xf32>
    %90 = arith.mulf %88, %89 : vector<2x8x8xf32>
    %91 = vector.shape_cast %30 : vector<2x8xi1> to vector<2x1x8xi1>
    %cst_29 = arith.constant -1.000000e+10 : f32
    %92 = vector.shape_cast %91 : vector<2x1x8xi1> to vector<2x1x8xi1>
    %93 = vector.broadcast %92 : vector<2x1x8xi1> to vector<2x8x8xi1>
    %94 = vector.broadcast %cst_29 : f32 to vector<2x8x8xf32>
    %95 = arith.select %93, %90, %94 : vector<2x8x8xi1>, vector<2x8x8xf32>
    %cst_30 = arith.constant dense<0xFF800000> : vector<2x8xf32>
    %96 = vector.multi_reduction <maximumf>, %95, %cst_30 [2] : vector<2x8x8xf32> to vector<2x8xf32>
    %97 = vector.shape_cast %96 : vector<2x8xf32> to vector<2x8x1xf32>
    %98 = vector.broadcast %97 : vector<2x8x1xf32> to vector<2x8x8xf32>
    %99 = arith.subf %95, %98 : vector<2x8x8xf32>
    %100 = math.exp %99 : vector<2x8x8xf32>
    %cst_31 = arith.constant dense<0.000000e+00> : vector<2x8xf32>
    %101 = vector.multi_reduction <add>, %100, %cst_31 [2] : vector<2x8x8xf32> to vector<2x8xf32>
    %102 = vector.shape_cast %101 : vector<2x8xf32> to vector<2x8x1xf32>
    %103 = tpu.reciprocal %102 {approx = true} : vector<2x8x1xf32> -> vector<2x8x1xf32>
    %104 = vector.broadcast %103 : vector<2x8x1xf32> to vector<2x8x8xf32>
    %105 = arith.mulf %100, %104 : vector<2x8x8xf32>
    "tpu.trace_start"() <{level = 10 : i32, message = "blm,bmd->bld"}> : () -> ()
    %cst_32 = arith.constant dense<0.000000e+00> : vector<2x8x8xf32>
    %106 = tpu.matmul %105, %87, %cst_32 {dimension_numbers = #tpu.dot_dimension_numbers<[2], [1], [1], [2], [0, 0, 0, 1, 1, 2], [0], [0]>} : vector<2x8x8xf32>, vector<2x8x8xf32>, vector<2x8x8xf32> -> vector<2x8x8xf32>
    "tpu.trace_stop"() : () -> ()
    %107 = vector.shape_cast %106 : vector<2x8x8xf32> to vector<16x8xf32>
    %108 = vector.extract_strided_slice %55 {offsets = [8, 0], sizes = [8, 32], strides = [1, 1]} : vector<32x32xf32> to vector<8x32xf32>
    %cst_33 = arith.constant dense<0.000000e+00> : vector<16x32xf32>
    %109 = tpu.matmul %107, %108, %cst_33 {dimension_numbers = #tpu.dot_dimension_numbers<[1], [0], [0], [1], [0, 0, 1, 1], [], []>} : vector<16x8xf32>, vector<8x32xf32>, vector<16x32xf32> -> vector<16x32xf32>
    %110 = arith.addf %84, %109 : vector<16x32xf32>
    %111 = vector.extract_strided_slice %50 {offsets = [0, 0, 16], sizes = [2, 8, 8], strides = [1, 1, 1]} : vector<2x8x32xf32> to vector<2x8x8xf32>
    %112 = vector.extract_strided_slice %52 {offsets = [0, 0, 16], sizes = [2, 8, 8], strides = [1, 1, 1]} : vector<2x8x32xf32> to vector<2x8x8xf32>
    %113 = vector.extract_strided_slice %54 {offsets = [0, 0, 16], sizes = [2, 8, 8], strides = [1, 1, 1]} : vector<2x8x32xf32> to vector<2x8x8xf32>
    "tpu.trace_start"() <{level = 10 : i32, message = "bld,bmd->blm"}> : () -> ()
    %cst_34 = arith.constant dense<0.000000e+00> : vector<2x8x8xf32>
    %114 = tpu.matmul %111, %112, %cst_34 {dimension_numbers = #tpu.dot_dimension_numbers<[2], [2], [1], [1], [0, 0, 0, 1, 1, 1], [0], [0]>} : vector<2x8x8xf32>, vector<2x8x8xf32>, vector<2x8x8xf32> -> vector<2x8x8xf32>
    "tpu.trace_stop"() : () -> ()
    %115 = vector.broadcast %57 : f32 to vector<2x8x8xf32>
    %116 = arith.mulf %114, %115 : vector<2x8x8xf32>
    %117 = vector.shape_cast %30 : vector<2x8xi1> to vector<2x1x8xi1>
    %cst_35 = arith.constant -1.000000e+10 : f32
    %118 = vector.shape_cast %117 : vector<2x1x8xi1> to vector<2x1x8xi1>
    %119 = vector.broadcast %118 : vector<2x1x8xi1> to vector<2x8x8xi1>
    %120 = vector.broadcast %cst_35 : f32 to vector<2x8x8xf32>
    %121 = arith.select %119, %116, %120 : vector<2x8x8xi1>, vector<2x8x8xf32>
    %cst_36 = arith.constant dense<0xFF800000> : vector<2x8xf32>
    %122 = vector.multi_reduction <maximumf>, %121, %cst_36 [2] : vector<2x8x8xf32> to vector<2x8xf32>
    %123 = vector.shape_cast %122 : vector<2x8xf32> to vector<2x8x1xf32>
    %124 = vector.broadcast %123 : vector<2x8x1xf32> to vector<2x8x8xf32>
    %125 = arith.subf %121, %124 : vector<2x8x8xf32>
    %126 = math.exp %125 : vector<2x8x8xf32>
    %cst_37 = arith.constant dense<0.000000e+00> : vector<2x8xf32>
    %127 = vector.multi_reduction <add>, %126, %cst_37 [2] : vector<2x8x8xf32> to vector<2x8xf32>
    %128 = vector.shape_cast %127 : vector<2x8xf32> to vector<2x8x1xf32>
    %129 = tpu.reciprocal %128 {approx = true} : vector<2x8x1xf32> -> vector<2x8x1xf32>
    %130 = vector.broadcast %129 : vector<2x8x1xf32> to vector<2x8x8xf32>
    %131 = arith.mulf %126, %130 : vector<2x8x8xf32>
    "tpu.trace_start"() <{level = 10 : i32, message = "blm,bmd->bld"}> : () -> ()
    %cst_38 = arith.constant dense<0.000000e+00> : vector<2x8x8xf32>
    %132 = tpu.matmul %131, %113, %cst_38 {dimension_numbers = #tpu.dot_dimension_numbers<[2], [1], [1], [2], [0, 0, 0, 1, 1, 2], [0], [0]>} : vector<2x8x8xf32>, vector<2x8x8xf32>, vector<2x8x8xf32> -> vector<2x8x8xf32>
    "tpu.trace_stop"() : () -> ()
    %133 = vector.shape_cast %132 : vector<2x8x8xf32> to vector<16x8xf32>
    %134 = vector.extract_strided_slice %55 {offsets = [16, 0], sizes = [8, 32], strides = [1, 1]} : vector<32x32xf32> to vector<8x32xf32>
    %cst_39 = arith.constant dense<0.000000e+00> : vector<16x32xf32>
    %135 = tpu.matmul %133, %134, %cst_39 {dimension_numbers = #tpu.dot_dimension_numbers<[1], [0], [0], [1], [0, 0, 1, 1], [], []>} : vector<16x8xf32>, vector<8x32xf32>, vector<16x32xf32> -> vector<16x32xf32>
    %136 = arith.addf %110, %135 : vector<16x32xf32>
    %137 = vector.extract_strided_slice %50 {offsets = [0, 0, 24], sizes = [2, 8, 8], strides = [1, 1, 1]} : vector<2x8x32xf32> to vector<2x8x8xf32>
    %138 = vector.extract_strided_slice %52 {offsets = [0, 0, 24], sizes = [2, 8, 8], strides = [1, 1, 1]} : vector<2x8x32xf32> to vector<2x8x8xf32>
    %139 = vector.extract_strided_slice %54 {offsets = [0, 0, 24], sizes = [2, 8, 8], strides = [1, 1, 1]} : vector<2x8x32xf32> to vector<2x8x8xf32>
    "tpu.trace_start"() <{level = 10 : i32, message = "bld,bmd->blm"}> : () -> ()
    %cst_40 = arith.constant dense<0.000000e+00> : vector<2x8x8xf32>
    %140 = tpu.matmul %137, %138, %cst_40 {dimension_numbers = #tpu.dot_dimension_numbers<[2], [2], [1], [1], [0, 0, 0, 1, 1, 1], [0], [0]>} : vector<2x8x8xf32>, vector<2x8x8xf32>, vector<2x8x8xf32> -> vector<2x8x8xf32>
    "tpu.trace_stop"() : () -> ()
    %141 = vector.broadcast %57 : f32 to vector<2x8x8xf32>
    %142 = arith.mulf %140, %141 : vector<2x8x8xf32>
    %143 = vector.shape_cast %30 : vector<2x8xi1> to vector<2x1x8xi1>
    %cst_41 = arith.constant -1.000000e+10 : f32
    %144 = vector.shape_cast %143 : vector<2x1x8xi1> to vector<2x1x8xi1>
    %145 = vector.broadcast %144 : vector<2x1x8xi1> to vector<2x8x8xi1>
    %146 = vector.broadcast %cst_41 : f32 to vector<2x8x8xf32>
    %147 = arith.select %145, %142, %146 : vector<2x8x8xi1>, vector<2x8x8xf32>
    %cst_42 = arith.constant dense<0xFF800000> : vector<2x8xf32>
    %148 = vector.multi_reduction <maximumf>, %147, %cst_42 [2] : vector<2x8x8xf32> to vector<2x8xf32>
    %149 = vector.shape_cast %148 : vector<2x8xf32> to vector<2x8x1xf32>
    %150 = vector.broadcast %149 : vector<2x8x1xf32> to vector<2x8x8xf32>
    %151 = arith.subf %147, %150 : vector<2x8x8xf32>
    %152 = math.exp %151 : vector<2x8x8xf32>
    %cst_43 = arith.constant dense<0.000000e+00> : vector<2x8xf32>
    %153 = vector.multi_reduction <add>, %152, %cst_43 [2] : vector<2x8x8xf32> to vector<2x8xf32>
    %154 = vector.shape_cast %153 : vector<2x8xf32> to vector<2x8x1xf32>
    %155 = tpu.reciprocal %154 {approx = true} : vector<2x8x1xf32> -> vector<2x8x1xf32>
    %156 = vector.broadcast %155 : vector<2x8x1xf32> to vector<2x8x8xf32>
    %157 = arith.mulf %152, %156 : vector<2x8x8xf32>
    "tpu.trace_start"() <{level = 10 : i32, message = "blm,bmd->bld"}> : () -> ()
    %cst_44 = arith.constant dense<0.000000e+00> : vector<2x8x8xf32>
    %158 = tpu.matmul %157, %139, %cst_44 {dimension_numbers = #tpu.dot_dimension_numbers<[2], [1], [1], [2], [0, 0, 0, 1, 1, 2], [0], [0]>} : vector<2x8x8xf32>, vector<2x8x8xf32>, vector<2x8x8xf32> -> vector<2x8x8xf32>
    "tpu.trace_stop"() : () -> ()
    %159 = vector.shape_cast %158 : vector<2x8x8xf32> to vector<16x8xf32>
    %160 = vector.extract_strided_slice %55 {offsets = [24, 0], sizes = [8, 32], strides = [1, 1]} : vector<32x32xf32> to vector<8x32xf32>
    %cst_45 = arith.constant dense<0.000000e+00> : vector<16x32xf32>
    %161 = tpu.matmul %159, %160, %cst_45 {dimension_numbers = #tpu.dot_dimension_numbers<[1], [0], [0], [1], [0, 0, 1, 1], [], []>} : vector<16x8xf32>, vector<8x32xf32>, vector<16x32xf32> -> vector<16x32xf32>
    %162 = arith.addf %136, %161 : vector<16x32xf32>
    %163 = arith.addf %44, %162 : vector<16x32xf32>
    %cst_46 = arith.constant dense<0.000000e+00> : vector<16xf32>
    %164 = vector.multi_reduction <add>, %163, %cst_46 [1] : vector<16x32xf32> to vector<16xf32>
    %165 = vector.shape_cast %164 : vector<16xf32> to vector<16x1xf32>
    %cst_47 = arith.constant 3.200000e+01 : f32
    %166 = vector.broadcast %cst_47 : f32 to vector<16x1xf32>
    %167 = arith.divf %165, %166 : vector<16x1xf32>
    %168 = vector.broadcast %167 : vector<16x1xf32> to vector<16x32xf32>
    %169 = arith.subf %163, %168 : vector<16x32xf32>
    %170 = arith.mulf %169, %169 : vector<16x32xf32>
    %cst_48 = arith.constant dense<0.000000e+00> : vector<16xf32>
    %171 = vector.multi_reduction <add>, %170, %cst_48 [1] : vector<16x32xf32> to vector<16xf32>
    %172 = vector.shape_cast %171 : vector<16xf32> to vector<16x1xf32>
    %cst_49 = arith.constant 3.200000e+01 : f32
    %173 = vector.broadcast %cst_49 : f32 to vector<16x1xf32>
    %174 = arith.divf %172, %173 : vector<16x1xf32>
    %175 = vector.broadcast %167 : vector<16x1xf32> to vector<16x32xf32>
    %176 = arith.subf %163, %175 : vector<16x32xf32>
    %cst_50 = arith.constant 9.99999974E-6 : f32
    %177 = vector.broadcast %cst_50 : f32 to vector<16x1xf32>
    %178 = arith.addf %174, %177 : vector<16x1xf32>
    %179 = math.rsqrt %178 : vector<16x1xf32>
    %180 = vector.broadcast %179 : vector<16x1xf32> to vector<16x32xf32>
    %181 = arith.mulf %176, %180 : vector<16x32xf32>
    %182 = vector.broadcast %4 : vector<1x32xf32> to vector<16x32xf32>
    %183 = arith.mulf %181, %182 : vector<16x32xf32>
    %184 = vector.broadcast %5 : vector<1x32xf32> to vector<16x32xf32>
    %185 = arith.addf %183, %184 : vector<16x32xf32>
    %c0_51 = arith.constant 0 : index
    %c0_52 = arith.constant 0 : index
    %186 = vector.load %arg6[%c0_51, %c0_52] : memref<32x64xf32, #tpu.memory_space<vmem>>, vector<32x64xf32>
    %cst_53 = arith.constant dense<0.000000e+00> : vector<16x64xf32>
    %187 = tpu.matmul %185, %186, %cst_53 {dimension_numbers = #tpu.dot_dimension_numbers<[1], [0], [0], [1], [0, 0, 1, 1], [], []>} : vector<16x32xf32>, vector<32x64xf32>, vector<16x64xf32> -> vector<16x64xf32>
    %188 = vector.broadcast %6 : vector<1x64xf32> to vector<16x64xf32>
    %189 = arith.addf %187, %188 : vector<16x64xf32>
    %cst_54 = arith.constant 0.000000e+00 : f32
    %190 = vector.broadcast %cst_54 : f32 to vector<16x64xf32>
    %191 = arith.maximumf %189, %190 : vector<16x64xf32>
    %c0_55 = arith.constant 0 : index
    %c0_56 = arith.constant 0 : index
    %192 = vector.load %arg7[%c0_55, %c0_56] : memref<64x32xf32, #tpu.memory_space<vmem>>, vector<64x32xf32>
    %cst_57 = arith.constant dense<0.000000e+00> : vector<16x32xf32>
    %193 = tpu.matmul %191, %192, %cst_57 {dimension_numbers = #tpu.dot_dimension_numbers<[1], [0], [0], [1], [0, 0, 1, 1], [], []>} : vector<16x64xf32>, vector<64x32xf32>, vector<16x32xf32> -> vector<16x32xf32>
    %194 = vector.broadcast %7 : vector<1x32xf32> to vector<16x32xf32>
    %195 = arith.addf %193, %194 : vector<16x32xf32>
    %196 = arith.addf %185, %195 : vector<16x32xf32>
    %cst_58 = arith.constant dense<0.000000e+00> : vector<16xf32>
    %197 = vector.multi_reduction <add>, %196, %cst_58 [1] : vector<16x32xf32> to vector<16xf32>
    %198 = vector.shape_cast %197 : vector<16xf32> to vector<16x1xf32>
    %cst_59 = arith.constant 3.200000e+01 : f32
    %199 = vector.broadcast %cst_59 : f32 to vector<16x1xf32>
    %200 = arith.divf %198, %199 : vector<16x1xf32>
    %201 = vector.broadcast %200 : vector<16x1xf32> to vector<16x32xf32>
    %202 = arith.subf %196, %201 : vector<16x32xf32>
    %203 = arith.mulf %202, %202 : vector<16x32xf32>
    %cst_60 = arith.constant dense<0.000000e+00> : vector<16xf32>
    %204 = vector.multi_reduction <add>, %203, %cst_60 [1] : vector<16x32xf32> to vector<16xf32>
    %205 = vector.shape_cast %204 : vector<16xf32> to vector<16x1xf32>
    %cst_61 = arith.constant 3.200000e+01 : f32
    %206 = vector.broadcast %cst_61 : f32 to vector<16x1xf32>
    %207 = arith.divf %205, %206 : vector<16x1xf32>
    %208 = vector.broadcast %200 : vector<16x1xf32> to vector<16x32xf32>
    %209 = arith.subf %196, %208 : vector<16x32xf32>
    %cst_62 = arith.constant 9.99999974E-6 : f32
    %210 = vector.broadcast %cst_62 : f32 to vector<16x1xf32>
    %211 = arith.addf %207, %210 : vector<16x1xf32>
    %212 = math.rsqrt %211 : vector<16x1xf32>
    %213 = vector.broadcast %212 : vector<16x1xf32> to vector<16x32xf32>
    %214 = arith.mulf %209, %213 : vector<16x32xf32>
    %215 = vector.broadcast %8 : vector<1x32xf32> to vector<16x32xf32>
    %216 = arith.mulf %214, %215 : vector<16x32xf32>
    %217 = vector.broadcast %9 : vector<1x32xf32> to vector<16x32xf32>
    %218 = arith.addf %216, %217 : vector<16x32xf32>
    %c0_63 = arith.constant 0 : index
    %c0_64 = arith.constant 0 : index
    %219 = vector.load %arg8[%c0_63, %c0_64] : memref<32x10xf32, #tpu.memory_space<vmem>>, vector<32x10xf32>
    %cst_65 = arith.constant dense<0.000000e+00> : vector<16x10xf32>
    %220 = tpu.matmul %218, %219, %cst_65 {dimension_numbers = #tpu.dot_dimension_numbers<[1], [0], [0], [1], [0, 0, 1, 1], [], []>} : vector<16x32xf32>, vector<32x10xf32>, vector<16x10xf32> -> vector<16x10xf32>
    %221 = vector.broadcast %10 : vector<1x10xf32> to vector<16x10xf32>
    %222 = arith.addf %220, %221 : vector<16x10xf32>
    %c0_66 = arith.constant 0 : index
    %c0_67 = arith.constant 0 : index
    %223 = vector.load %arg10[%c0_66, %c0_67] : memref<16x10xf32, #tpu.memory_space<vmem>>, vector<16x10xf32>
    tpu.vector_store %arg10[%c0_66, %c0_67], %222 {strides = array<i32>} : memref<16x10xf32, #tpu.memory_space<vmem>>, vector<16x10xf32>,
    return
  }
}

</mosaic_0001>

<bundles_post_ra>
// kernel: seq2seq_without_decoder.1
= control target key start
LH: loop header
LB: loop body
LE: loop exit
PB: predicated region body
PF: predicated region fallthrough
CT: control target
= control target key end

     0   :  { %v2944_v2 = vmov 0.0|0.0   ;;  %vm2945_vm0 = vmmov 0   ;;  %v2946_v4 = vmov 0.0   ;;  %s3438_s0 = inlined_call_operand.vmem [shape: f32[2,16], index: 0, kind: input, shape index: {}]   ;;  %s3439_s1 = inlined_call_operand.vmem [shape: f32[16,8], index: 1, kind: input, shape index: {}]   ;;  %s3440_s2 = inlined_call_operand.vmem [shape: f32[256,32], index: 2, kind: input, shape index: {}]   ;;  %s3441_s3 = inlined_call_operand.vmem [shape: f32[16,32], index: 3, kind: input, shape index: {}]   ;;  %s3442_s4 = inlined_call_operand.vmem [shape: f32[32,96], index: 4, kind: input, shape index: {}]   ;;  %s3443_s5 = inlined_call_operand.vmem [shape: f32[32,32], index: 5, kind: input, shape index: {}]   ;;  %s3444_s6 = inlined_call_operand.vmem [shape: f32[32,64], index: 6, kind: input, shape index: {}]   ;;  %s3445_s7 = inlined_call_operand.vmem [shape: f32[64,32], index: 7, kind: input, shape index: {}]   ;;  %s3446_s8 = inlined_call_operand.vmem [shape: f32[32,10], index: 8, kind: input, shape index: {}]   ;;  %s3447_s9 = inlined_call_operand.vmem [shape: f32[10,96], index: 9, kind: input, shape index: {}]   ;;  %s3448_s10 = inlined_call_operand.hbm [shape: f32[16,10], index: 10, kind: output, shape index: {}]  }
   0x1   :  { %v39_v0 = vld [vmem:[%s3439_s1] sm:$0xff]  ;;  %v40_v1 = vld [vmem:[%s3439_s1 + $0x8] sm:$0xff]  ;;  %2772 = vmatprep.subr.bf16.mxu1 %v2944_v2  ;;  %2617 = vmatprep.mubr.msk.f32.mxu1 %vm2945_vm0, %v2946_v4 }
   0x2   :  { %v2773_v3 = vpack.c.bf16 %v40_v1, %v39_v0 }
   0x3   :  { %15 = vsyncpa [#allocation3], 0  ;;  %v38_v5 = vld [vmem:[%s3438_s0] sm:$0x3]  ;;  %vm45_vm1 = vcmask 130048   ;;  %v41_v6 = vlaneseq  ;;  %vm119_vm2 = vcmask 58368  }
   0x4   :  { %2774 = vmatpush3.bf16.msra.mxu1 %v2773_v3  ;;  %v3039_v9 = vld [vmem:[%s3447_s9] sm:$0xff]  ;;  %v179_v19 = vld [vmem:[%s3440_s2 + $0x88] sm:$0xff]  ;;  %v180_v23 = vld [vmem:[%s3440_s2 + $0x90] sm:$0xff]  ;;  %vm283_vm7 = vcmask 261120   ;;  %vm372_vm8 = vcmask 64512   ;;  %s2951_s27 = smov 64  }
   0x5   :  { %v3031_v7 = vshrl.u32 %v41_v6, 7  ;;  %v178_v18 = vld [vmem:[%s3440_s2 + $0x80] sm:$0xff]  ;;  %v163_v22 = vld [vmem:[%s3440_s2 + $0x8] sm:$0xff]  ;;  %v181_v24 = vld [vmem:[%s3440_s2 + $0x98] sm:$0xff]  ;;  %s2952_s28 = smov 120   ;;  %s2953_s29 = smov 88  }
   0x6   :  { %v162_v20 = vld [vmem:[%s3440_s2] sm:$0xff]  ;;  %v2775_v21 = vpack.c.bf16 %v179_v19, %v178_v18  ;;  %v2779_v26 = vpack.c.bf16 %v181_v24, %v180_v23  ;;  %v164_v27 = vld [vmem:[%s3440_s2 + $0x10] sm:$0xff]  ;;  %v165_v28 = vld [vmem:[%s3440_s2 + $0x18] sm:$0xff]  ;;  %v134_v18 = vand.u32 127, %v41_v6  ;;  %s2954_s12 = smov 80   ;;  %s2955_s13 = smov 112  }
   0x7   :  { %2618 = vmatmul.mubr.msk.f32.vlgmr.msra.gmra.mrb[0].mxu1 %vm45_vm1, %v38_v5  ;;  %v3034_v8 = vsub.s32 0, %v3031_v7  ;;  %v2777_v25 = vpack.c.bf16 %v163_v22, %v162_v20  ;;  %v182_v29 = vld [vmem:[%s3440_s2 + $0xa0] sm:$0xff]  ;;  %v183_v30 = vld [vmem:[%s3440_s2 + $0xa8] sm:$0xff]  ;;  %v2781_v31 = vpack.c.bf16 %v165_v28, %v164_v27  ;;  %v184_v35 = vld [vmem:[%s3440_s2 + $0xb0] sm:$0xff]  ;;  %s2956_s14 = smov 56   ;;  %s2957_s15 = smov 48  }
   0x8   :  { %2776 = vmatprep.subr.bf16.mxu1 %v2775_v21  ;;  %v2783_v32 = vpack.c.bf16 %v183_v30, %v182_v29  ;;  %v166_v33 = vld [vmem:[%s3440_s2 + $0x20] sm:$0xff]  ;;  %v167_v34 = vld [vmem:[%s3440_s2 + $0x28] sm:$0xff]  ;;  %v185_v36 = vld [vmem:[%s3440_s2 + $0xb8] sm:$0xff]  ;;  %v135_v19 = vadd.s32 128, %v134_v18  ;;  %s2958_s16 = smov 72   ;;  %s2959_s17 = smov 104  }
   0x9   :  { %v44_v10 = vrot.slane %v3039_v9, %v3034_v8  ;;  %2778 = vmatpush3.bf16.msra.mxu1 %v2777_v25  ;;  %v2785_v37 = vpack.c.bf16 %v167_v34, %v166_v33  ;;  %v2787_v38 = vpack.c.bf16 %v185_v36, %v184_v35  ;;  %v168_v39 = vld [vmem:[%s3440_s2 + $0x30] sm:$0xff]  ;;  %v169_v40 = vld [vmem:[%s3440_s2 + $0x38] sm:$0xff]  ;;  %v186_v41 = vld [vmem:[%s3440_s2 + $0xc0] sm:$0xff]  ;;  %s2960_s0 = smov 40   ;;  %vm2221_vm14 = vcmask 523264  }
   0xa   :  { %2780 = vmatprep.subr.bf16.mxu1 %v2779_v26  ;;  %v187_v42 = vld [vmem:[%s3440_s2 + $0xc8] sm:$0xff]  ;;  %v2789_v43 = vpack.c.bf16 %v169_v40, %v168_v39  ;;  %v170_v45 = vld [vmem:[%s3440_s2 + $0x40] sm:$0xff]  ;;  %v188_v47 = vld [vmem:[%s3440_s2 + $0xd0] sm:$0xff]  ;;  %vm2432_vm15 = vcmask 80896  }
   0xb   :  { %v2791_v44 = vpack.c.bf16 %v187_v42, %v186_v41  ;;  %v171_v46 = vld [vmem:[%s3440_s2 + $0x48] sm:$0xff]  ;;  %v189_v48 = vld [vmem:[%s3440_s2 + $0xd8] sm:$0xff]  ;;  %v172_v51 = vld [vmem:[%s3440_s2 + $0x50] sm:$0xff] }
   0xc   :  { %v2793_v49 = vpack.c.bf16 %v171_v46, %v170_v45  ;;  %v2795_v50 = vpack.c.bf16 %v189_v48, %v188_v47  ;;  %v173_v52 = vld [vmem:[%s3440_s2 + $0x58] sm:$0xff]  ;;  %v190_v53 = vld [vmem:[%s3440_s2 + $0xe0] sm:$0xff]  ;;  %v191_v54 = vld [vmem:[%s3440_s2 + $0xe8] sm:$0xff]  ;;  %v2949_v46 = vmov 1966171168  }
   0xd   :  { %2782 = vmatpush3.bf16.msra.mxu1 %v2781_v31  ;;  %v2797_v55 = vpack.c.bf16 %v173_v52, %v172_v51  ;;  %v2799_v56 = vpack.c.bf16 %v191_v54, %v190_v53  ;;  %v174_v57 = vld [vmem:[%s3440_s2 + $0x60] sm:$0xff]  ;;  %v175_v58 = vld [vmem:[%s3440_s2 + $0x68] sm:$0xff]  ;;  %v192_v59 = vld [vmem:[%s3440_s2 + $0xf0] sm:$0xff]  ;;  %v528_v47 = vunpack.c.l.s4 %v2949_v46 }
   0xe   :  { %2784 = vmatprep.subr.bf16.mxu1 %v2783_v32  ;;  %v193_v60 = vld [vmem:[%s3440_s2 + $0xf8] sm:$0xff]  ;;  %v2801_v61 = vpack.c.bf16 %v175_v58, %v174_v57  ;;  %v176_v63 = vld [vmem:[%s3440_s2 + $0x70] sm:$0xff]  ;;  %v275_v22 = vld [vmem:[%s3442_s4] sm:$0xff] }
   0xf   :  { %v2803_v62 = vpack.c.bf16 %v193_v60, %v192_v59  ;;  %v177_v0 = vld [vmem:[%s3440_s2 + $0x78] sm:$0xff]  ;;  %v276_v6 = vld [vmem:[%s3442_s4 + $0x8] sm:$0xff]  ;;  %v277_v24 = vld [vmem:[%s3442_s4 + $0x10] sm:$0xff]  ;;  %v529_v48 = vunpack.c.0.s8 %v528_v47 }
  0x10   :  { %v2805_v1 = vpack.c.bf16 %v177_v0, %v176_v63  ;;  %v2807_v23 = vpack.c.bf16 %v276_v6, %v275_v22  ;;  %v278_v25 = vld [vmem:[%s3442_s4 + $0x18] sm:$0xff]  ;;  %v271_v30 = vld [vmem:[%s3441_s3] sm:$0xff]  ;;  %v272_v36 = vld [vmem:[%s3441_s3 + $0x8] sm:$0xff]  ;;  %s2948_s3 = smov 96  }
  0x11   :  { %2786 = vmatpush3.bf16.msra.mxu1 %v2785_v37  ;;  %v2811_v26 = vpack.c.bf16 %v278_v25, %v277_v24 }
  0x12   :  { %2788 = vmatprep.subr.bf16.mxu1 %v2787_v38  ;;  %2808 = vmatprep.subr.bf16.mxu0 %v2807_v23 }
  0x13   :  { %2810 = vmatpush3.bf16.msra.mxu0 %v2807_v23 }
  0x14   :  { %2812 = vmatprep.subr.bf16.mxu0 %v2811_v26 }
  0x15   :  { %2790 = vmatpush3.bf16.msra.mxu1 %v2789_v43 }
  0x16   :  { %2792 = vmatprep.subr.bf16.mxu1 %v2791_v44 }
  0x17   :  { %2814 = vmatpush3.bf16.msra.mxu0 %v2811_v26 }
  0x18   :  { %2631 = vmatprep.subr.mxu0 %v2946_v4 }
  0x19   :  { %2794 = vmatpush3.bf16.msra.mxu1 %v2793_v49  ;;  %v532_v49 = vsub.s32 %v529_v48, %v3031_v7 }
  0x1a   :  { %2796 = vmatprep.subr.bf16.mxu1 %v2795_v50  ;;  %v2950_v50 = vmov 0  }
  0x1d   :  { %2798 = vmatpush3.bf16.msra.mxu1 %v2797_v55 }
  0x1e   :  { %2800 = vmatprep.subr.bf16.mxu1 %v2799_v56 }
  0x21   :  { %2802 = vmatpush3.bf16.msra.mxu1 %v2801_v61 }
  0x22   :  { %2804 = vmatprep.subr.bf16.mxu1 %v2803_v62 }
  0x25   :  { %2806 = vmatpush3.bf16.msra.mxu1 %v2805_v1 }
  0x26   :  { %2666 = vmatprep.subr.mxu1 %v2946_v4 }
  0xda   :  { %v115_v11 = vpop.f32.mrb[0].mxu1 }
  0xdb   :  { %v116_v12 = vadd.f32 %v115_v11, %v44_v10  ;;  %v2619_v13 = vpop.f32.mrb[1].mxu1 }
  0xdd   :  { %v120_v14 = vsel %vm119_vm2, %v116_v12, inf }
  0xde   :  { %121 = vmin.xlane.f32.xlu0 %v120_v14 }
 0x16b   :  { %v122_v15 = vpop.xlane.xlu0 %121 }
 0x16c   :  { %v3043_v16 = vsub.f32 %v116_v12, %v122_v15  ;;  %v3149_v15 = vsub.s32 1, %v3031_v7 }
 0x16e   :  { %v124_v17 = vsel %vm119_vm2, %v3043_v16, -inf  ;;  %v282_v39 = vrot.slane %v3039_v9, %v3149_v15 }
 0x16f   :  { %125 = vmax.xlane.f32.xlu0 %v124_v17 }
 0x1fc   :  { %v126_v2 = vpop.xlane.xlu0 %125 }
 0x1fd   :  { %v127_v3 = vmax.f32 %v126_v2, 1e-12 }
 0x1ff   :  { %2877 = vrcp.f32 %v127_v3 }
 0x209   :  { %v2878_v5 = vpop.eup %2877 }
 0x20a   :  { %v129_v10 = vmul.f32 %v2878_v5, %v3043_v16  ;;  %v2947_v16 = vmov 1.0  }
 0x20c   :  { %v130_v11 = vmul.f32 255.0, %v129_v10 }
 0x20e   :  { %v2855_v12 = vtrunc.f32 %v130_v11 }
 0x210   :  { %v3144_v13 = vcvt.f32.s32 %v2855_v12 }
 0x212   :  { %v139_v14 = vrot.slane %v3144_v13, %v3034_v8  ;;  %v146_v17 = vrot.slane %v3144_v13, %v3149_v15  ;;  %vm132_vm9 = vcmp.ne.s32.totalorder %v3144_v13, 1 }
 0x213   :  { %v526_v51 = vsel %vm132_vm9, 1, %v2950_v50 }
 0x214   :  { %141 = vbcast.lane.b32.xlu1 %v139_v14, 256  ;;  %v533_v52 = vrot.slane %v526_v51, %v532_v49 }
 0x216   :  { %v541_v53 = vrot.slane %v533_v52, %v532_v49  ;;  %v534_v54 = vcombine.high %v533_v52, %v533_v52 }
 0x218   :  { %148 = vbcast.lane.b32.xlu1 %v146_v17, 256  ;;  %vm549_vm10 = vcmp.ne.s32.totalorder %v541_v53, 0  ;;  %v548_v55 = vrot.slane %v534_v54, %v532_v49 }
 0x219   :  { %v551_v56 = vsel %vm549_vm10, 1, %v2950_v50 }
 0x21a   :  { %vm550_vm11 = vcmp.ne.s32.totalorder %v548_v55, 0  ;;  %v556_v57 = vrot.slane %v551_v56, %v3034_v8 }
 0x21b   :  { %v552_v58 = vsel %vm550_vm11, 1, %v2950_v50 }
 0x21c   :  { %vm3208_vm12 = vcmp.eq.s32.totalorder %v556_v57, 1  ;;  %v560_v63 = vrot.slane %v552_v58, %v3034_v8 }
 0x21e   :  { %vm3216_vm13 = vcmp.eq.s32.totalorder %v560_v63, 1 }
 0x286   :  { %v142_v20 = vpop.permute.xlu1 %141 }
 0x287   :  { %vm150_vm3 = vcmp.eq.s32.totalorder %v142_v20, %v134_v18  ;;  %vm151_vm4 = vcmp.eq.s32.totalorder %v142_v20, %v135_v19 }
 0x288   :  { %2456 = vmatprep.mubr.msk.f32.mxu1 %vm151_vm4, %v2947_v16 }
 0x289   :  { %2457 = vmatmul.mubr.msk.f32.vlgmr.msra.gmra.mrb[2].mxu1 %vm150_vm3, %v2947_v16 }
 0x28a   :  { %v149_v21 = vpop.permute.xlu1 %148 }
 0x28b   :  { %vm152_vm5 = vcmp.eq.s32.totalorder %v149_v21, %v134_v18  ;;  %vm153_vm6 = vcmp.eq.s32.totalorder %v149_v21, %v135_v19 }
 0x28c   :  { %2458 = vmatprep.mubr.msk.f32.mxu1 %vm153_vm6, %v2947_v16 }
 0x28d   :  { %2459 = vmatmul.mubr.msk.f32.gmra.mrb[4].mxu1 %vm152_vm5, %v2947_v16 }
 0x28e   :  { %2668 = vmatprep.mubr.msk.f32.mxu1 %vm2945_vm0, %v2946_v4 }
 0x35c   :  { %v2535_v27 = vpop.f32.mrb[2].mxu1 }
 0x35d   :  { %v2536_v28 = vpop.f32.mrb[3].mxu1 }
 0x35e   :  { %v2537_v29 = vadd.f32 %v2536_v28, %v2535_v27  ;;  %v365_v28 = vld [vmem:[%s3443_s5] sm:$0xff] }
 0x360   :  { %v269_v31 = vmul.f32 5.656854, %v2537_v29  ;;  %v2538_v32 = vpop.f32.mrb[4].mxu1 }
 0x361   :  { %v2539_v33 = vpop.f32.mrb[5].mxu1 }
 0x362   :  { %v2540_v34 = vadd.f32 %v2539_v33, %v2538_v32  ;;  %v3172_v35 = vadd.f32 %v271_v30, %v269_v31 }
 0x364   :  { %v270_v37 = vmul.f32 5.656854, %v2540_v34  ;;  %2628 = vmatprep.mubr.msk.f32.mxu0 %vm283_vm7, %v3172_v35 }
 0x366   :  { %v3179_v38 = vadd.f32 %v272_v36, %v270_v37 }
 0x368   :  { %2629 = vmatmul.mubr.msk.f32.vlgmr.msra.gmra.mrb[0].mxu0 %vm283_vm7, %v3179_v38 }
 0x369   :  { %2633 = vmatprep.mubr.msk.f32.mxu0 %vm2945_vm0, %v2946_v4 }
 0x43b   :  { %v2630_v40 = vpop.f32.mrb[0].mxu0 }
 0x43c   :  { %v3187_v41 = vadd.f32 %v2630_v40, %v282_v39  ;;  %v356_v42 = vpop.f32.mrb[1].mxu0 }
 0x43d   :  { %v3189_v43 = vadd.f32 %v356_v42, %v282_v39 }
 0x43e   :  { %448 = vrot.lane.b32.xlu1 %v3187_v41, %s2948_s3 }
 0x43f   :  { %370 = vrot.lane.b32.xlu0 %v3189_v43, %s2948_s3 }
 0x4b0   :  { %v449_v45 = vpop.permute.xlu1 %448 }
 0x4b1   :  { %v371_v44 = vpop.permute.xlu0 %370 }
 0x4b2   :  { %2632 = vmatpush3.xpose.msk.msra.mxu0 %vm372_vm8, %v371_v44 }
 0x4b3   :  { %2636 = vmatprep.subr.mxu0 %v2946_v4 }
 0x4b5   :  { %2634 = vmatmul.mubr.msk.f32.vlgmr.msra.gmra.mrb[2].mxu0 %vm372_vm8, %v3189_v43 }
 0x4b6   :  { %2637 = vmatpush3.xpose.msk.msra.mxu0 %vm372_vm8, %v449_v45  ;;  %2638 = vmatprep.mubr.msk.f32.mxu0 %vm2945_vm0, %v2946_v4 }
 0x4b7   :  { %2641 = vmatprep.subr.mxu0 %v2946_v4 }
 0x4b9   :  { %2639 = vmatmul.mubr.msk.f32.vlgmr.msra.gmra.mrb[4].mxu0 %vm372_vm8, %v3187_v41 }
 0x4ba   :  { %2643 = vmatprep.mubr.msk.f32.mxu0 %vm2945_vm0, %v2946_v4 }
 0x588   :  { %v443_v59 = vpop.f32.mrb[2].mxu0 }
 0x589   :  { %v524_v60 = vmul.f32 0.35355338, %v443_v59  ;;  %v2635_v61 = vpop.f32.mrb[3].mxu0 }
 0x58b   :  { %v563_v0 = vsel %vm3208_vm12, %v524_v60, -1e+10 }
 0x58c   :  { %v520_v1 = vpop.f32.mrb[4].mxu0  ;;  %v565_v2 = vsel %vm372_vm8, %v563_v0, -inf }
 0x58d   :  { %v525_v3 = vmul.f32 0.35355338, %v520_v1  ;;  %v2640_v5 = vpop.f32.mrb[5].mxu0  ;;  %566 = vmax.xlane.f32.xlu1 %v565_v2 }
 0x58f   :  { %v564_v11 = vsel %vm3216_vm13, %v525_v3, -1e+10 }
 0x590   :  { %v568_v12 = vsel %vm372_vm8, %v564_v11, -inf }
 0x591   :  { %569 = vmax.xlane.f32.xlu0 %v568_v12 }
 0x5a7   :  { %663 = vrot.lane.b32.xlu0 %v3187_v41, %s2951_s27 }
 0x5ab   :  { %904 = vrot.lane.b32.xlu0 %v3187_v41, %s2952_s28 }
 0x61a   :  { %v567_v13 = vpop.xlane.xlu1 %566 }
 0x61b   :  { %v571_v14 = vsub.f32 %v563_v0, %v567_v13 }
 0x61d   :  { %v573_v17 = vmul.f32 1.442695, %v571_v14 }
 0x61e   :  { %v570_v18 = vpop.xlane.xlu0 %569 }
 0x61f   :  { %2879 = vpow2.f32 %v573_v17  ;;  %v572_v19 = vsub.f32 %v564_v11, %v570_v18 }
 0x621   :  { %v575_v20 = vmul.f32 1.442695, %v572_v19 }
 0x622   :  { %v664_v29 = vpop.permute.xlu0 %663 }
 0x623   :  { %2881 = vpow2.f32 %v575_v20 }
 0x626   :  { %v905_v42 = vpop.permute.xlu0 %904 }
 0x629   :  { %v2880_v16 = vpop.eup %2879 }
 0x62a   :  { %v577_v21 = vsel %vm372_vm8, %v2880_v16, 0.0 }
 0x62b   :  { %578 = vadd.xlane.f32.xlu1 %v577_v21 }
 0x62d   :  { %v2882_v22 = vpop.eup %2881 }
 0x62e   :  { %v580_v6 = vsel %vm372_vm8, %v2882_v22, 0.0 }
 0x62f   :  { %581 = vadd.xlane.f32.xlu1 %v580_v6 }
 0x640   :  { %587 = vrot.lane.b32.xlu1 %v3189_v43, %s2951_s27 }
 0x644   :  { %828 = vrot.lane.b32.xlu1 %v3189_v43, %s2953_s29 }
 0x648   :  { %826 = vrot.lane.b32.xlu1 %v3189_v43, %s2952_s28 }
 0x64c   :  { %906 = vrot.lane.b32.xlu1 %v3187_v41, %s2953_s29 }
 0x6b8   :  { %v579_v23 = vpop.xlane.xlu1 %578 }
 0x6b9   :  { %2883 = vrcp.f32 %v579_v23 }
 0x6bc   :  { %v582_v24 = vpop.xlane.xlu1 %581 }
 0x6bd   :  { %2885 = vrcp.f32 %v582_v24 }
 0x6c0   :  { %v588_v25 = vpop.permute.xlu1 %587 }
 0x6c1   :  { %2642 = vmatpush3.msra.mxu0 %v588_v25 }
 0x6c2   :  { %2646 = vmatprep.subr.mxu0 %v2946_v4 }
 0x6c3   :  { %v2884_v26 = vpop.eup %2883 }
 0x6c4   :  { %v585_v27 = vmul.f32 %v2884_v26, %v2880_v16  ;;  %v829_v32 = vpop.permute.xlu1 %828 }
 0x6c6   :  { %2644 = vmatmul.mubr.msk.f32.vlgmr.msra.gmra.mrb[6].mxu0 %vm372_vm8, %v585_v27 }
 0x6c7   :  { %v2886_v30 = vpop.eup %2885  ;;  %2647 = vmatpush3.msra.mxu0 %v664_v29  ;;  %2648 = vmatprep.mubr.msk.f32.mxu0 %vm2945_vm0, %v2946_v4 }
 0x6c8   :  { %v586_v31 = vmul.f32 %v2886_v30, %v2882_v22  ;;  %2651 = vmatprep.subr.mxu0 %v365_v28  ;;  %v827_v36 = vpop.permute.xlu1 %826 }
 0x6ca   :  { %2649 = vmatmul.mubr.msk.f32.vlgmr.msra.gmra.mrb[8].mxu0 %vm372_vm8, %v586_v31  ;;  %v366_v31 = vld [vmem:[%s3443_s5 + $0x8] sm:$0xff] }
 0x6cb   :  { %2652 = vmatpush3.msra.mxu0 %v365_v28 }
 0x6cc   :  { %2656 = vmatprep.subr.mxu0 %v2946_v4  ;;  %v907_v40 = vpop.permute.xlu1 %906 }
 0x799   :  { %v659_v33 = vpop.f32.mrb[6].mxu0 }
 0x79a   :  { %v2645_v34 = vpop.f32.mrb[7].mxu0  ;;  %2653 = vmatprep.mubr.msk.f32.mxu0 %vm372_vm8, %v659_v33 }
 0x79d   :  { %v735_v37 = vpop.f32.mrb[8].mxu0 }
 0x79e   :  { %v2650_v39 = vpop.f32.mrb[9].mxu0  ;;  %2654 = vmatmul.mubr.msk.f32.vlgmr.msra.gmra.mrb[10].mxu0 %vm372_vm8, %v735_v37 }
 0x79f   :  { %2657 = vmatpush3.xpose.msk.msra.mxu0 %vm372_vm8, %v829_v32  ;;  %2658 = vmatprep.mubr.msk.f32.mxu0 %vm2945_vm0, %v2946_v4 }
 0x7a0   :  { %2661 = vmatprep.subr.mxu0 %v2946_v4 }
 0x7a2   :  { %2659 = vmatmul.mubr.msk.f32.vlgmr.msra.gmra.mrb[12].mxu0 %vm372_vm8, %v827_v36 }
 0x7a3   :  { %2662 = vmatpush3.xpose.msk.msra.mxu0 %vm372_vm8, %v907_v40  ;;  %2663 = vmatprep.mubr.msk.f32.mxu0 %vm2945_vm0, %v2946_v4 }
 0x7a4   :  { %2671 = vmatprep.subr.mxu0 %v2946_v4 }
 0x7a6   :  { %2664 = vmatmul.mubr.msk.f32.vlgmr.msra.gmra.mrb[14].mxu0 %vm372_vm8, %v905_v42 }
 0x7a7   :  { %2673 = vmatprep.mubr.msk.f32.mxu0 %vm2945_vm0, %v2946_v4 }
 0x875   :  { %v900_v44 = vpop.f32.mrb[12].mxu0 }
 0x876   :  { %v982_v45 = vmul.f32 0.35355338, %v900_v44  ;;  %v2660_v46 = vpop.f32.mrb[13].mxu0 }
 0x878   :  { %v984_v47 = vsel %vm3208_vm12, %v982_v45, -1e+10 }
 0x879   :  { %v978_v48 = vpop.f32.mrb[14].mxu0  ;;  %v986_v49 = vsel %vm372_vm8, %v984_v47, -inf }
 0x87a   :  { %987 = vmax.xlane.f32.xlu1 %v986_v49  ;;  %v2665_v50 = vpop.f32.mrb[15].mxu0  ;;  %v983_v56 = vmul.f32 0.35355338, %v978_v48 }
 0x87c   :  { %v985_v57 = vsel %vm3216_vm13, %v983_v56, -1e+10 }
 0x87d   :  { %v989_v58 = vsel %vm372_vm8, %v985_v57, -inf }
 0x88b   :  { %1245 = vrot.lane.b32.xlu1 %v3189_v43, %s2954_s12 }
 0x88f   :  { %1243 = vrot.lane.b32.xlu1 %v3189_v43, %s2955_s13 }
 0x893   :  { %1321 = vrot.lane.b32.xlu1 %v3187_v41, %s2955_s13 }
 0x907   :  { %v988_v51 = vpop.xlane.xlu1 %987 }
 0x908   :  { %v992_v52 = vsub.f32 %v984_v47, %v988_v51  ;;  %v367_v47 = vld [vmem:[%s3443_s5 + $0x10] sm:$0xff] }
 0x90a   :  { %v994_v53 = vmul.f32 1.442695, %v992_v52 }
 0x90b   :  { %v1246_v61 = vpop.permute.xlu1 %1245 }
 0x90c   :  { %2887 = vpow2.f32 %v994_v53 }
 0x90f   :  { %v1244_v1 = vpop.permute.xlu1 %1243 }
 0x913   :  { %v1322_v3 = vpop.permute.xlu1 %1321 }
 0x916   :  { %v2888_v54 = vpop.eup %2887 }
 0x917   :  { %v998_v55 = vsel %vm372_vm8, %v2888_v54, 0.0 }
 0x918   :  { %999 = vadd.xlane.f32.xlu0 %v998_v55 }
 0x92e   :  { %1008 = vrot.lane.b32.xlu0 %v3189_v43, %s2956_s14 }
 0x932   :  { %1323 = vrot.lane.b32.xlu0 %v3187_v41, %s2954_s12 }
 0x951   :  { %990 = vmax.xlane.f32.xlu0 %v989_v58 }
 0x967   :  { %1084 = vrot.lane.b32.xlu0 %v3187_v41, %s2956_s14 }
 0x96b   :  { %1425 = vrot.lane.b32.xlu0 %v3189_v43, %s2957_s15 }
 0x96f   :  { %1662 = vrot.lane.b32.xlu0 %v3189_v43, %s2958_s16 }
 0x973   :  { %1740 = vrot.lane.b32.xlu0 %v3187_v41, %s2958_s16 }
 0x977   :  { %1660 = vrot.lane.b32.xlu0 %v3189_v43, %s2959_s17 }
 0x97b   :  { %1738 = vrot.lane.b32.xlu0 %v3187_v41, %s2959_s17 }
 0x9a5   :  { %v1000_v59 = vpop.xlane.xlu0 %999 }
 0x9a6   :  { %2889 = vrcp.f32 %v1000_v59 }
 0x9a9   :  { %v1009_v60 = vpop.permute.xlu0 %1008 }
 0x9aa   :  { %2667 = vmatpush3.msra.mxu1 %v1009_v60 }
 0x9ab   :  { %2681 = vmatprep.subr.mxu1 %v2946_v4 }
 0x9ad   :  { %v1324_v2 = vpop.permute.xlu0 %1323 }
 0x9b0   :  { %v2890_v63 = vpop.eup %2889 }
 0x9b1   :  { %v1006_v0 = vmul.f32 %v2890_v63, %v2888_v54 }
 0x9b3   :  { %2669 = vmatmul.mubr.msk.f32.vlgmr.msra.gmra.mrb[6].mxu1 %vm372_vm8, %v1006_v0 }
 0x9b4   :  { %2682 = vmatpush3.xpose.msk.msra.mxu1 %vm372_vm8, %v1246_v61  ;;  %2683 = vmatprep.mubr.msk.f32.mxu1 %vm2945_vm0, %v2946_v4 }
 0x9b5   :  { %2686 = vmatprep.subr.mxu1 %v2946_v4 }
 0x9b7   :  { %2684 = vmatmul.mubr.msk.f32.vlgmr.msra.gmra.mrb[8].mxu1 %vm372_vm8, %v1244_v1 }
 0x9b8   :  { %2687 = vmatpush3.xpose.msk.msra.mxu1 %vm372_vm8, %v1324_v2  ;;  %2688 = vmatprep.mubr.msk.f32.mxu1 %vm2945_vm0, %v2946_v4 }
 0x9b9   :  { %2696 = vmatprep.subr.mxu1 %v2946_v4 }
 0x9bb   :  { %2689 = vmatmul.mubr.msk.f32.vlgmr.msra.gmra.mrb[10].mxu1 %vm372_vm8, %v1322_v3 }
 0x9bc   :  { %2698 = vmatprep.mubr.msk.f32.mxu1 %vm2945_vm0, %v2946_v4 }
 0x9de   :  { %v991_v5 = vpop.xlane.xlu0 %990 }
 0x9df   :  { %v993_v11 = vsub.f32 %v985_v57, %v991_v5 }
 0x9e1   :  { %v996_v12 = vmul.f32 1.442695, %v993_v11 }
 0x9e2   :  { %v1085_v13 = vpop.permute.xlu0 %1084 }
 0x9e3   :  { %2891 = vpow2.f32 %v996_v12  ;;  %2672 = vmatpush3.msra.mxu0 %v1085_v13 }
 0x9e4   :  { %2676 = vmatprep.subr.mxu0 %v366_v31 }
 0x9e6   :  { %v1426_v48 = vpop.permute.xlu0 %1425 }
 0x9ea   :  { %v1663_v53 = vpop.permute.xlu0 %1662 }
 0x9ed   :  { %v2892_v14 = vpop.eup %2891 }
 0x9ee   :  { %v1001_v17 = vsel %vm372_vm8, %v2892_v14, 0.0  ;;  %v1741_v57 = vpop.permute.xlu0 %1740 }
 0x9ef   :  { %1002 = vadd.xlane.f32.xlu1 %v1001_v17 }
 0x9f2   :  { %v1661_v59 = vpop.permute.xlu0 %1660 }
 0x9f6   :  { %v1739_v1 = vpop.permute.xlu0 %1738 }
 0xa7c   :  { %v1003_v18 = vpop.xlane.xlu1 %1002 }
 0xa7d   :  { %2893 = vrcp.f32 %v1003_v18 }
 0xa86   :  { %v1080_v19 = vpop.f32.mrb[6].mxu1 }
 0xa87   :  { %v2894_v20 = vpop.eup %2893  ;;  %v2670_v16 = vpop.f32.mrb[7].mxu1 }
 0xa88   :  { %v1007_v21 = vmul.f32 %v2894_v20, %v2892_v14 }
 0xa8a   :  { %2674 = vmatmul.mubr.msk.f32.vlgmr.msra.gmra.mrb[16].mxu0 %vm372_vm8, %v1007_v21  ;;  %v1317_v22 = vpop.f32.mrb[8].mxu1 }
 0xa8b   :  { %v1399_v6 = vmul.f32 0.35355338, %v1317_v22  ;;  %2678 = vmatprep.mubr.msk.f32.mxu0 %vm372_vm8, %v1080_v19  ;;  %v2685_v23 = vpop.f32.mrb[9].mxu1  ;;  %2677 = vmatpush3.msra.mxu0 %v366_v31 }
 0xa8c   :  { %2691 = vmatprep.subr.mxu0 %v2946_v4 }
 0xa8d   :  { %v1401_v24 = vsel %vm3208_vm12, %v1399_v6, -1e+10 }
 0xa8e   :  { %v1395_v25 = vpop.f32.mrb[10].mxu1  ;;  %v1403_v26 = vsel %vm372_vm8, %v1401_v24, -inf }
 0xa8f   :  { %v1400_v27 = vmul.f32 0.35355338, %v1395_v25  ;;  %v2690_v28 = vpop.f32.mrb[11].mxu1  ;;  %1404 = vmax.xlane.f32.xlu1 %v1403_v26 }
 0xa91   :  { %v1402_v29 = vsel %vm3216_vm13, %v1400_v27, -1e+10 }
 0xa92   :  { %v1406_v30 = vsel %vm372_vm8, %v1402_v29, -inf }
 0xa93   :  { %1407 = vmax.xlane.f32.xlu1 %v1406_v30 }
 0xb1c   :  { %v1405_v32 = vpop.xlane.xlu1 %1404 }
 0xb1d   :  { %v1409_v33 = vsub.f32 %v1401_v24, %v1405_v32 }
 0xb1f   :  { %v1411_v34 = vmul.f32 1.442695, %v1409_v33 }
 0xb20   :  { %v1408_v36 = vpop.xlane.xlu1 %1407 }
 0xb21   :  { %2895 = vpow2.f32 %v1411_v34  ;;  %v1410_v37 = vsub.f32 %v1402_v29, %v1408_v36 }
 0xb23   :  { %v1413_v39 = vmul.f32 1.442695, %v1410_v37  ;;  %v822_v37 = vsub.s32 2, %v3031_v7 }
 0xb25   :  { %2897 = vpow2.f32 %v1413_v39  ;;  %v823_v39 = vrot.slane %v3039_v9, %v822_v37 }
 0xb2b   :  { %v2896_v40 = vpop.eup %2895 }
 0xb2c   :  { %v1415_v42 = vsel %vm372_vm8, %v2896_v40, 0.0 }
 0xb2d   :  { %1416 = vadd.xlane.f32.xlu1 %v1415_v42 }
 0xb2f   :  { %v2898_v44 = vpop.eup %2897 }
 0xb30   :  { %v1418_v45 = vsel %vm372_vm8, %v2898_v44, 0.0 }
 0xb31   :  { %1419 = vadd.xlane.f32.xlu1 %v1418_v45 }
 0xb42   :  { %1501 = vrot.lane.b32.xlu1 %v3187_v41, %s2957_s15 }
 0xb5d   :  { %v1156_v46 = vpop.f32.mrb[16].mxu0 }
 0xb5e   :  { %v2675_v49 = vpop.f32.mrb[17].mxu0  ;;  %2679 = vmatmul.mubr.msk.f32.vlgmr.msra.gmra.mrb[10].mxu0 %vm372_vm8, %v1156_v46 }
 0xb5f   :  { %2692 = vmatpush3.msra.mxu0 %v1426_v48  ;;  %2693 = vmatprep.mubr.msk.f32.mxu0 %vm2945_vm0, %v2946_v4 }
 0xb60   :  { %2701 = vmatprep.subr.mxu0 %v367_v47 }
 0xbba   :  { %v1417_v50 = vpop.xlane.xlu1 %1416 }
 0xbbb   :  { %2899 = vrcp.f32 %v1417_v50 }
 0xbbe   :  { %v1420_v51 = vpop.xlane.xlu1 %1419 }
 0xbbf   :  { %2901 = vrcp.f32 %v1420_v51 }
 0xbc2   :  { %v1502_v52 = vpop.permute.xlu1 %1501 }
 0xbc3   :  { %2697 = vmatpush3.msra.mxu1 %v1502_v52 }
 0xbc4   :  { %2706 = vmatprep.subr.mxu1 %v2946_v4 }
 0xbc5   :  { %v2900_v54 = vpop.eup %2899 }
 0xbc6   :  { %v1423_v55 = vmul.f32 %v2900_v54, %v2896_v40 }
 0xbc8   :  { %2694 = vmatmul.mubr.msk.f32.vlgmr.msra.gmra.mrb[18].mxu0 %vm372_vm8, %v1423_v55 }
 0xbc9   :  { %v2902_v56 = vpop.eup %2901  ;;  %2702 = vmatpush3.msra.mxu0 %v367_v47 }
 0xbca   :  { %v1424_v58 = vmul.f32 %v2902_v56, %v2898_v44  ;;  %2711 = vmatprep.subr.mxu0 %v2946_v4 }
 0xbcc   :  { %2699 = vmatmul.mubr.msk.f32.vlgmr.msra.gmra.mrb[12].mxu1 %vm372_vm8, %v1424_v58 }
 0xbcd   :  { %2707 = vmatpush3.xpose.msk.msra.mxu1 %vm372_vm8, %v1663_v53  ;;  %2708 = vmatprep.mubr.msk.f32.mxu1 %vm2945_vm0, %v2946_v4 }
 0xbce   :  { %2716 = vmatprep.subr.mxu1 %v2946_v4 }
 0xbd0   :  { %2709 = vmatmul.mubr.msk.f32.vlgmr.msra.gmra.mrb[14].mxu1 %vm372_vm8, %v1661_v59  ;;  %v2119_v59 = vld [vmem:[%s3444_s6 + $0x8] sm:$0xff] }
 0xbd1   :  { %2718 = vmatprep.mubr.msk.f32.mxu1 %vm2945_vm0, %v2946_v4 }
 0xc9b   :  { %v1497_v60 = vpop.f32.mrb[18].mxu0 }
 0xc9c   :  { %v2695_v61 = vpop.f32.mrb[19].mxu0  ;;  %2703 = vmatprep.mubr.msk.f32.mxu0 %vm372_vm8, %v1497_v60 }
 0xc9d   :  { %v2120_v61 = vld [vmem:[%s3444_s6 + $0x10] sm:$0xff] }
 0xc9f   :  { %v1573_v63 = vpop.f32.mrb[12].mxu1 }
 0xca0   :  { %v2700_v0 = vpop.f32.mrb[13].mxu1  ;;  %2704 = vmatmul.mubr.msk.f32.vlgmr.msra.gmra.mrb[10].mxu0 %vm372_vm8, %v1573_v63  ;;  %v2121_v63 = vld [vmem:[%s3444_s6 + $0x18] sm:$0xff] }
 0xca1   :  { %2712 = vmatpush3.xpose.msk.msra.mxu0 %vm372_vm8, %v1741_v57  ;;  %2713 = vmatprep.mubr.msk.f32.mxu0 %vm2945_vm0, %v2946_v4  ;;  %v2819_v0 = vpack.c.bf16 %v2121_v63, %v2120_v61  ;;  %v2343_v63 = vld [vmem:[%s3446_s8] sm:$0xff] }
 0xca2   :  { %2721 = vmatprep.subr.mxu0 %v2946_v4 }
 0xca3   :  { %v1734_v2 = vpop.f32.mrb[14].mxu1 }
 0xca4   :  { %v1816_v3 = vmul.f32 0.35355338, %v1734_v2  ;;  %v2710_v5 = vpop.f32.mrb[15].mxu1  ;;  %2714 = vmatmul.mubr.msk.f32.vlgmr.msra.gmra.mrb[20].mxu0 %vm372_vm8, %v1739_v1  ;;  %v2209_v1 = vld [vmem:[%s3445_s7] sm:$0xff]  ;;  %v2210_v2 = vld [vmem:[%s3445_s7 + $0x8] sm:$0xff] }
 0xca5   :  { %2723 = vmatprep.mubr.msk.f32.mxu0 %vm2945_vm0, %v2946_v4  ;;  %v2823_v5 = vpack.c.bf16 %v2210_v2, %v2209_v1  ;;  %v2345_v2 = vld [vmem:[%s3446_s8 + $0x10] sm:$0xff] }
 0xca6   :  { %v1818_v11 = vsel %vm3208_vm12, %v1816_v3, -1e+10  ;;  %v2211_v3 = vld [vmem:[%s3445_s7 + $0x10] sm:$0xff] }
 0xca7   :  { %v1820_v12 = vsel %vm372_vm8, %v1818_v11, -inf }
 0xca8   :  { %1821 = vmax.xlane.f32.xlu1 %v1820_v12 }
 0xd35   :  { %v1822_v13 = vpop.xlane.xlu1 %1821 }
 0xd36   :  { %v1826_v14 = vsub.f32 %v1818_v11, %v1822_v13  ;;  %v2212_v11 = vld [vmem:[%s3445_s7 + $0x18] sm:$0xff]  ;;  %v2213_v13 = vld [vmem:[%s3445_s7 + $0x20] sm:$0xff] }
 0xd37   :  { %v2827_v12 = vpack.c.bf16 %v2212_v11, %v2211_v3  ;;  %v2346_v3 = vld [vmem:[%s3446_s8 + $0x18] sm:$0xff] }
 0xd38   :  { %v1828_v17 = vmul.f32 1.442695, %v1826_v14  ;;  %v2214_v14 = vld [vmem:[%s3445_s7 + $0x28] sm:$0xff] }
 0xd3a   :  { %2903 = vpow2.f32 %v1828_v17  ;;  %v2831_v17 = vpack.c.bf16 %v2214_v14, %v2213_v13 }
 0xd44   :  { %v2904_v22 = vpop.eup %2903 }
 0xd45   :  { %v1832_v4 = vsel %vm372_vm8, %v2904_v22, 0.0 }
 0xd77   :  { %v1812_v18 = vpop.f32.mrb[20].mxu0 }
 0xd78   :  { %v1817_v19 = vmul.f32 0.35355338, %v1812_v18  ;;  %v2715_v20 = vpop.f32.mrb[21].mxu0 }
 0xd7a   :  { %v1819_v16 = vsel %vm3216_vm13, %v1817_v19, -1e+10 }
 0xd7b   :  { %v1823_v21 = vsel %vm372_vm8, %v1819_v16, -inf }
 0xd7c   :  { %1824 = vmax.xlane.f32.xlu0 %v1823_v21 }
 0xd80   :  { %1833 = vadd.xlane.f32.xlu0 %v1832_v4  ;;  %v2108_v4 = vsub.s32 3, %v3031_v7 }
 0xd96   :  { %1842 = vrot.lane.b32.xlu0 %v3189_v43, %s2960_s0  ;;  %v368_v43 = vld [vmem:[%s3443_s5 + $0x18] sm:$0xff] }
 0xe09   :  { %v1825_v62 = vpop.xlane.xlu0 %1824 }
 0xe0a   :  { %v1827_v6 = vsub.f32 %v1819_v16, %v1825_v62  ;;  %v2114_v62 = vsub.s32 4, %v3031_v7 }
 0xe0c   :  { %v1830_v23 = vmul.f32 1.442695, %v1827_v6  ;;  %v2109_v6 = vrot.slane %v3039_v9, %v2108_v4 }
 0xe0d   :  { %v1834_v24 = vpop.xlane.xlu0 %1833 }
 0xe0e   :  { %2905 = vpow2.f32 %v1830_v23 }
 0xe0f   :  { %2907 = vrcp.f32 %v1834_v24 }
 0xe11   :  { %v1843_v25 = vpop.permute.xlu0 %1842 }
 0xe12   :  { %2717 = vmatpush3.msra.mxu1 %v1843_v25 }
 0xe18   :  { %v2906_v10 = vpop.eup %2905 }
 0xe19   :  { %v2908_v26 = vpop.eup %2907  ;;  %v1835_v27 = vsel %vm372_vm8, %v2906_v10, 0.0 }
 0xe1a   :  { %v1840_v28 = vmul.f32 %v2908_v26, %v2904_v22  ;;  %1836 = vadd.xlane.f32.xlu1 %v1835_v27  ;;  %v2115_v26 = vrot.slane %v3039_v9, %v2114_v62  ;;  %v2124_v9 = vsub.s32 5, %v3031_v7 }
 0xe1c   :  { %2719 = vmatmul.mubr.msk.f32.vlgmr.msra.gmra.mrb[16].mxu1 %vm372_vm8, %v1840_v28 }
 0xe2b   :  { %1918 = vrot.lane.b32.xlu1 %v3187_v41, %s2960_s0 }
 0xea7   :  { %v1837_v29 = vpop.xlane.xlu1 %1836 }
 0xea8   :  { %2909 = vrcp.f32 %v1837_v29 }
 0xeab   :  { %v1919_v30 = vpop.permute.xlu1 %1918 }
 0xeac   :  { %2722 = vmatpush3.msra.mxu0 %v1919_v30  ;;  %v2215_v30 = vld [vmem:[%s3445_s7 + $0x30] sm:$0xff] }
 0xead   :  { %2726 = vmatprep.subr.mxu0 %v368_v43 }
 0xeb2   :  { %v2910_v31 = vpop.eup %2909 }
 0xeb3   :  { %v1841_v32 = vmul.f32 %v2910_v31, %v2906_v10  ;;  %v2216_v31 = vld [vmem:[%s3445_s7 + $0x38] sm:$0xff] }
 0xeb5   :  { %2724 = vmatmul.mubr.msk.f32.vlgmr.msra.gmra.mrb[22].mxu0 %vm372_vm8, %v1841_v32  ;;  %v2835_v32 = vpack.c.bf16 %v2216_v31, %v2215_v30 }
 0xeb6   :  { %2727 = vmatpush3.msra.mxu0 %v368_v43 }
 0xeb7   :  { %2824 = vmatprep.subr.bf16.mxu0 %v2823_v5 }
 0xeef   :  { %v1914_v33 = vpop.f32.mrb[16].mxu1 }
 0xef0   :  { %v2720_v34 = vpop.f32.mrb[17].mxu1  ;;  %2728 = vmatprep.mubr.msk.f32.mxu0 %vm372_vm8, %v1914_v33  ;;  %v2919_v33 = vld [vmem:[%s3447_s9] sm:$0xff] }
 0xef1   :  { %v2125_v34 = vrot.slane %v2919_v33, %v2124_v9 }
 0xf88   :  { %v1990_v36 = vpop.f32.mrb[22].mxu0 }
 0xf89   :  { %v2725_v41 = vpop.f32.mrb[23].mxu0  ;;  %2729 = vmatmul.mubr.msk.f32.vlgmr.msra.gmra.mrb[10].mxu0 %vm372_vm8, %v1990_v36 }
 0xf8a   :  { %2826 = vmatpush3.bf16.msra.mxu0 %v2823_v5  ;;  %v2843_v5 = vpack.c.bf16 %v2346_v3, %v2345_v2 }
 0xf8b   :  { %2828 = vmatprep.subr.bf16.mxu0 %v2827_v12 }
 0xf8e   :  { %2830 = vmatpush3.bf16.msra.mxu0 %v2827_v12 }
 0xf8f   :  { %2832 = vmatprep.subr.bf16.mxu0 %v2831_v17 }
 0xf92   :  { %2834 = vmatpush3.bf16.msra.mxu0 %v2831_v17 }
 0xf93   :  { %2836 = vmatprep.subr.bf16.mxu0 %v2835_v32 }
 0xf96   :  { %2838 = vmatpush3.bf16.msra.mxu0 %v2835_v32 }
0x105c   :  { %v2730_v40 = vpop.f32.mrb[10].mxu0 }
0x105d   :  { %v2847_v42 = vadd.f32 %v2730_v40, %v823_v39  ;;  %v2066_v44 = vpop.f32.mrb[11].mxu0 }
0x105e   :  { %v2848_v45 = vadd.f32 %v2066_v44, %v823_v39  ;;  %v2219_v44 = vsub.s32 6, %v3031_v7 }
0x105f   :  { %v2078_v46 = vadd.f32 %v2847_v42, %v3179_v38 }
0x1060   :  { %v2077_v47 = vadd.f32 %v2848_v45, %v3172_v35  ;;  %v2118_v35 = vld [vmem:[%s3444_s6] sm:$0xff]  ;;  %v2220_v45 = vrot.slane %v2919_v33, %v2219_v44 }
0x1061   :  { %v2082_v48 = vsel %vm283_vm7, %v2078_v46, 0.0  ;;  %v2815_v60 = vpack.c.bf16 %v2119_v59, %v2118_v35 }
0x1062   :  { %2083 = vadd.xlane.f32.xlu0 %v2082_v48  ;;  %v2079_v49 = vsel %vm283_vm7, %v2077_v47, 0.0 }
0x1063   :  { %2080 = vadd.xlane.f32.xlu1 %v2079_v49  ;;  %2816 = vmatprep.subr.bf16.mxu1 %v2815_v60 }
0x1064   :  { %2818 = vmatpush3.bf16.msra.mxu1 %v2815_v60 }
0x1065   :  { %2820 = vmatprep.subr.bf16.mxu1 %v2819_v0 }
0x1068   :  { %2822 = vmatpush3.bf16.msra.mxu1 %v2819_v0  ;;  %v2344_v0 = vld [vmem:[%s3446_s8 + $0x8] sm:$0xff]  ;;  %s2961_s8 = smov [#allocation2]  }
0x1069   :  { %v2839_v1 = vpack.c.bf16 %v2344_v0, %v2343_v63  ;;  %s2440_s27 = sshll.u32 %s2961_s8, 4  ;;  %s2441_s27 = int_to_ptr.vmem [resolvable:$true] %s2440_s27 }
0x106a   :  { %p2925_p1 = scmp.lt.s32.totalorder %s2441_s27, %s2441_s27 }
0x106b   :  { %2840 = vmatprep.subr.bf16.mxu1 %v2839_v1 }
0x10ef   :  { %v2084_v50 = vpop.xlane.xlu0 %2083 }
0x10f0   :  { %v2087_v51 = vmul.f32 0.03125, %v2084_v50  ;;  %v2081_v52 = vpop.xlane.xlu1 %2080 }
0x10f1   :  { %v2086_v53 = vmul.f32 0.03125, %v2081_v52 }
0x10f2   :  { %v2089_v54 = vsub.f32 %v2078_v46, %v2087_v51 }
0x10f3   :  { %v2088_v55 = vsub.f32 %v2077_v47, %v2086_v53 }
0x10f4   :  { %v2091_v56 = vmul.f32 %v2089_v54, %v2089_v54 }
0x10f5   :  { %v2090_v57 = vmul.f32 %v2088_v55, %v2088_v55 }
0x10f6   :  { %v2095_v58 = vsel %vm283_vm7, %v2091_v56, 0.0 }
0x10f7   :  { %2096 = vadd.xlane.f32.xlu1 %v2095_v58  ;;  %v2092_v38 = vsel %vm283_vm7, %v2090_v57, 0.0 }
0x10f8   :  { %2093 = vadd.xlane.f32.xlu0 %v2092_v38 }
0x1184   :  { %v2097_v18 = vpop.xlane.xlu1 %2096 }
0x1185   :  { %v2099_v19 = vmul.f32 0.03125, %v2097_v18  ;;  %v2094_v20 = vpop.xlane.xlu0 %2093 }
0x1186   :  { %v2098_v16 = vmul.f32 0.03125, %v2094_v20  ;;  %v37_v20 = vld [vmem:[%s3447_s9 + $0x8] sm:$0x3]  ;;  %s2920_s9 = scalar_lea.vmem %s2441_s27, 256 }
0x1187   :  { %v2101_v21 = vadd.f32 1e-05, %v2099_v19  ;;  %v2333_v19 = vsub.s32 7, %v3031_v7  ;;  %v2350_v7 = vrot.slane %v37_v20, %v3149_v15  ;;  %p2921_p0 = scmp.ne.s32.totalorder %s2441_s27, %s2920_s9  ;;  %p2926_p2 = scmp.lt.s32.totalorder %s2920_s9, %s2920_s9 }
0x1188   :  { %v2100_v22 = vadd.f32 1e-05, %v2098_v16 }
0x1189   :  { %2911 = vrsqrt.f32 %v2101_v21  ;;  %v2334_v16 = vrot.slane %v2919_v33, %v2333_v19  ;;  %p2927_p3 = por %p2926_p2, %p2925_p1 }
0x118a   :  { %2913 = vrsqrt.f32 %v2100_v22 }
0x118b   :  { %p2928_p4 = pnand %p2927_p3, %p2921_p0 }
0x1193   :  { %v2912_v23 = vpop.eup %2911 }
0x1194   :  { %v2914_v24 = vpop.eup %2913  ;;  %v2105_v25 = vmul.f32 %v2912_v23, %v2089_v54 }
0x1195   :  { %v2104_v10 = vmul.f32 %v2914_v24, %v2088_v55 }
0x1196   :  { %v2111_v27 = vmul.f32 %v2109_v6, %v2105_v25 }
0x1197   :  { %v2110_v28 = vmul.f32 %v2109_v6, %v2104_v10  ;;  %v2340_v6 = vrot.slane %v37_v20, %v3034_v8 }
0x1198   :  { %v2117_v43 = vadd.f32 %v2115_v26, %v2111_v27 }
0x1199   :  { %v2116_v29 = vadd.f32 %v2115_v26, %v2110_v28 }
0x119b   :  { %2739 = vmatprep.mubr.msk.f32.mxu1 %vm283_vm7, %v2116_v29 }
0x119c   :  { %2740 = vmatmul.mubr.msk.f32.vlgmr.msra.gmra.mrb[18].mxu1 %vm283_vm7, %v2117_v43 }
0x119d   :  { %2842 = vmatpush3.bf16.msra.mxu1 %v2839_v1 }
0x119e   :  { %2844 = vmatprep.subr.bf16.mxu1 %v2843_v5 }
0x11a1   :  { %2846 = vmatpush3.bf16.msra.mxu1 %v2843_v5 }
0x126f   :  { %v2741_v36 = vpop.f32.mrb[18].mxu1 }
0x1270   :  { %v2204_v41 = vadd.f32 %v2741_v36, %v2125_v34  ;;  %v2198_v37 = vpop.f32.mrb[19].mxu1 }
0x1271   :  { %v2199_v39 = vadd.f32 %v2198_v37, %v2125_v34 }
0x1272   :  { %v2208_v42 = vmax.f32 %v2204_v41, 0.0 }
0x1273   :  { %v2207_v40 = vmax.f32 %v2199_v39, 0.0 }
0x1275   :  { %2758 = vmatprep.mubr.msk.f32.mxu0 %vm2221_vm14, %v2207_v40 }
0x1276   :  { %2759 = vmatmul.mubr.msk.f32.vlgmr.msra.gmra.mrb[24].mxu0 %vm2221_vm14, %v2208_v42 }
0x1349   :  { %v2760_v46 = vpop.f32.mrb[24].mxu0 }
0x134a   :  { %v2300_v47 = vadd.f32 %v2760_v46, %v2220_v45  ;;  %v2294_v48 = vpop.f32.mrb[25].mxu0 }
0x134b   :  { %v2295_v49 = vadd.f32 %v2294_v48, %v2220_v45 }
0x134c   :  { %v2304_v50 = vadd.f32 %v2300_v47, %v2117_v43 }
0x134d   :  { %v2303_v51 = vadd.f32 %v2295_v49, %v2116_v29 }
0x134e   :  { %v2308_v52 = vsel %vm283_vm7, %v2304_v50, 0.0 }
0x134f   :  { %2309 = vadd.xlane.f32.xlu1 %v2308_v52  ;;  %v2305_v53 = vsel %vm283_vm7, %v2303_v51, 0.0 }
0x1350   :  { %2306 = vadd.xlane.f32.xlu0 %v2305_v53 }
0x13dc   :  { %v2310_v54 = vpop.xlane.xlu1 %2309 }
0x13dd   :  { %v2312_v55 = vmul.f32 0.03125, %v2310_v54  ;;  %v2307_v56 = vpop.xlane.xlu0 %2306 }
0x13de   :  { %v2311_v57 = vmul.f32 0.03125, %v2307_v56 }
0x13df   :  { %v2314_v58 = vsub.f32 %v2304_v50, %v2312_v55 }
0x13e0   :  { %v2313_v38 = vsub.f32 %v2303_v51, %v2311_v57 }
0x13e1   :  { %v2316_v35 = vmul.f32 %v2314_v58, %v2314_v58 }
0x13e2   :  { %v2315_v59 = vmul.f32 %v2313_v38, %v2313_v38 }
0x13e3   :  { %v2320_v60 = vsel %vm283_vm7, %v2316_v35, 0.0 }
0x13e4   :  { %2321 = vadd.xlane.f32.xlu1 %v2320_v60  ;;  %v2317_v61 = vsel %vm283_vm7, %v2315_v59, 0.0 }
0x13e5   :  { %2318 = vadd.xlane.f32.xlu0 %v2317_v61 }
0x1471   :  { %v2322_v11 = vpop.xlane.xlu1 %2321 }
0x1472   :  { %v2324_v12 = vmul.f32 0.03125, %v2322_v11  ;;  %v2319_v13 = vpop.xlane.xlu0 %2318 }
0x1473   :  { %v2323_v14 = vmul.f32 0.03125, %v2319_v13 }
0x1474   :  { %v2326_v17 = vadd.f32 1e-05, %v2324_v12 }
0x1475   :  { %v2325_v18 = vadd.f32 1e-05, %v2323_v14 }
0x1476   :  { %2915 = vrsqrt.f32 %v2326_v17 }
0x1477   :  { %2917 = vrsqrt.f32 %v2325_v18 }
0x1480   :  { %v2916_v21 = vpop.eup %2915 }
0x1481   :  { %v2918_v22 = vpop.eup %2917  ;;  %v2330_v4 = vmul.f32 %v2916_v21, %v2314_v58 }
0x1482   :  { %v2329_v62 = vmul.f32 %v2918_v22, %v2313_v38 }
0x1483   :  { %v2336_v23 = vmul.f32 %v2334_v16, %v2330_v4 }
0x1484   :  { %v2335_v24 = vmul.f32 %v2334_v16, %v2329_v62 }
0x1485   :  { %v2342_v10 = vadd.f32 %v2340_v6, %v2336_v23 }
0x1486   :  { %v2341_v25 = vadd.f32 %v2340_v6, %v2335_v24 }
0x1488   :  { %2769 = vmatprep.mubr.msk.f32.mxu1 %vm283_vm7, %v2341_v25 }
0x1489   :  { %2770 = vmatmul.mubr.msk.f32.vlgmr.msra.gmra.mrb[20].mxu1 %vm283_vm7, %v2342_v10 }
0x155c   :  { %v2771_v26 = vpop.f32.mrb[20].mxu1 }
0x155d   :  { %v2429_v27 = vadd.f32 %v2771_v26, %v2350_v7  ;;  %v2423_v28 = vpop.f32.mrb[21].mxu1 }
0x155e   :  { %v2424_v29 = vadd.f32 %v2423_v28, %v2350_v7 }
0x155f   :  { %2434 = vst.msk [vmem:[#allocation2 + $0x8] sm:$0xff] %vm2432_vm15, %v2429_v27 }
0x1560   :  { %2433 = vst.msk [vmem:[#allocation2] sm:$0xff] %vm2432_vm15, %v2424_v29 }
0x1561   :  { %2931 = shalt.err (!%p2928_p4)
}
0x1562   :  { %s2932_s30 = scalar_lea.hbm %s3448_s10, 256 }
0x1563   :  { %p2933_p5 = scmp.ne.s32.totalorder %s3448_s10, %s2932_s30  ;;  %p2936_p6 = scmp.lt.u32.totalorder %s2932_s30, %s3448_s10 }
0x1565   :  { %p2938_p7 = pnand %p2936_p6, %p2933_p5 }
0x1567   :  { %2941 = shalt.err (!%p2938_p7)
}
0x1568   :  { %s2962_s14 = smov 128   ;;  %s2963_s15 = smov 8  }
0x1569   :  { %2446 = dma.vmem_to_hbm [thread:$0]  %s2441_s27, 256, %s3448_s10, [#allocation3], %s2962_s14, %s2962_s14, %s2963_s15  }
0x156a   :  { %2942 = dma.done.wait [#allocation3], 256  }
0x156b   :  { %2943 = vsyncadd [#allocation3], 4294967040 }
0x156c   :  { %2450 = vsyncpa [#allocation3], 1 }

</bundles_post_ra>
